<compile_context>
chip_gen: v5e
topology: v5e:2x2
jax: 0.10.0
libtpu: 0.0.40
codegen_flags: <defaults>
</compile_context>

<pallas_src>
import jax
import jax.numpy as jnp
from jax.experimental import pallas as pl
from jax.experimental.pallas import tpu as pltpu

N_OUT_PAD = 128    # lane-dense padded width of the final (B, 2) output
HIDDEN_PAD = 128   # fc1 hidden dim padded 64 -> 128 (lane-dense sigmoid / fc2)


# ------------------------------ Pallas kernels ------------------------------ #

def _fc_tail(flat, w1_ref, b1_ref, w2_ref, b2_ref, out_ref):
    """fc1 -> sigmoid -> dropout(identity, eval) -> fc2, all in-register."""
    wdt = w1_ref.dtype
    z = jnp.dot(flat.astype(wdt), w1_ref[...], preferred_element_type=jnp.float32)
    z = jax.nn.sigmoid(z + b1_ref[...])
    # TODO(synk): nn.Dropout(p=0.3) is stochastic in training mode; eval-mode
    # identity is implemented here (pltpu.prng_seed/prng_random_bits for train).
    out = jnp.dot(z.astype(wdt), w2_ref[...], preferred_element_type=jnp.float32)
    out_ref[...] = (out + b2_ref[...]).astype(out_ref.dtype)


def fused_monitor_kernel(x_ref, wc_ref, bc_ref, w1_ref, b1_ref, w2_ref, b2_ref,
                         out_ref):
    """Primary: one conv matmul, in-register flatten, no scratch.

    x:   (block_b*T, K)  one conv window per row (b-major, t-minor)
    wc:  (K, C)          conv weight (transposed from torch's (C, 1, K))
    bc:  (1, C)  f32     conv bias
    w1:  (T*C, 128)      fc1 weight, rows permuted to window-major, cols padded
    b1:  (1, 128) f32
    w2:  (128, 128)      fc2 weight zero-padded (rows 64.. and cols 2.. are 0)
    b2:  (1, 128) f32
    out: (block_b, 128)  lane-dense padded output (valid cols = first 2)
    """
    bB = out_ref.shape[0]
    T = x_ref.shape[0] // bB
    C = wc_ref.shape[1]
    # Conv1d with in_channels=1 and stride == kernel_size acts on disjoint
    # windows, so the whole conv is ONE well-shaped MXU matmul.
    a = jnp.dot(x_ref[...], wc_ref[...], preferred_element_type=jnp.float32)
    a = jnp.maximum(a + bc_ref[...], 0.0)            # (bB*T, C); single bias add
    flat = a.reshape(bB, T * C)                      # window-major features t*C+c
    _fc_tail(flat, w1_ref, b1_ref, w2_ref, b2_ref, out_ref)


def scratch_monitor_kernel(x_ref, wc_ref, bc_ref, w1_ref, b1_ref, w2_ref, b2_ref,
                           out_ref, flat_ref):
    """Fallback: per-window matmuls into a VMEM scratch (no in-kernel reshape).

    x is (block_b, T*K) here; flat_ref is a (block_b, T*C) f32 scratch.
    """
    K, C = wc_ref.shape
    bB, TC = flat_ref.shape
    T = TC // C
    wc = wc_ref[...]
    bcb = jnp.broadcast_to(bc_ref[...], (bB, C))     # hoisted: one broadcast only
    for t in range(T):                               # static unroll
        xt = x_ref[:, t * K:(t + 1) * K]             # (bB, K)
        ct = jnp.dot(xt, wc, preferred_element_type=jnp.float32) + bcb
        flat_ref[:, t * C:(t + 1) * C] = jnp.maximum(ct, 0.0)
    _fc_tail(flat_ref[...], w1_ref, b1_ref, w2_ref, b2_ref, out_ref)


# ------------------------------ pallas_call build --------------------------- #

def _build_call(Bp, block_b, T, K, C, Hp, NP, fused):
    nb = Bp // block_b
    if fused:
        kernel = fused_monitor_kernel
        x_spec = pl.BlockSpec((block_b * T, K), lambda i: (i, 0))
        scratch = []
    else:
        kernel = scratch_monitor_kernel
        x_spec = pl.BlockSpec((block_b, T * K), lambda i: (i, 0))
        scratch = [pltpu.VMEM((block_b, T * C), jnp.float32)]
    return pl.pallas_call(
        kernel,
        out_shape=jax.ShapeDtypeStruct((Bp, NP), jnp.float32),
        grid_spec=pltpu.PrefetchScalarGridSpec(
            num_scalar_prefetch=0,
            grid=(nb,),
            in_specs=[
                x_spec,
                pl.BlockSpec((K, C), lambda i: (0, 0)),        # wc
                pl.BlockSpec((1, C), lambda i: (0, 0)),        # bc
                pl.BlockSpec((T * C, Hp), lambda i: (0, 0)),   # w1 (permuted+padded)
                pl.BlockSpec((1, Hp), lambda i: (0, 0)),       # b1 (padded)
                pl.BlockSpec((Hp, NP), lambda i: (0, 0)),      # w2 (padded)
                pl.BlockSpec((1, NP), lambda i: (0, 0)),       # b2 (padded)
            ],
            out_specs=pl.BlockSpec((block_b, NP), lambda i: (i, 0)),
            scratch_shapes=scratch,
        ),
        compiler_params=pltpu.CompilerParams(
            dimension_semantics=("parallel",),
            # Per-block footprint at block_b <= 1024 (f32) is ~15 MiB incl.
            # double buffering, so 32 MiB is safe on every generation (v7x has
            # only 64 MiB / TensorCore).  Raise toward 64-96 MiB on v5e/v6e if
            # block_b is ever pushed past ~2048.
            vmem_limit_bytes=32 * 1024 * 1024,
        ),
    )


def _choose_block_b(B):
    if B <= 512:
        return B                                    # single grid step, no padding
    # Aim for >=2 grid steps (v7x dual-TC sharding of the "parallel" axis),
    # keep blocks a multiple of 8 (sublane tiling), cap for v7x VMEM headroom.
    return min(1024, max(8, ((B + 15) // 16) * 8))


_FUSED_OK = {}   # dtype-name -> bool; Mosaic reshape support probed once per dtype


def model_monitor_forward(x, kp, *, kernel_size, stride, n_out=2, block_b=None):
    """Forward pass matching ModelMonitor.forward (eval mode).

    x:  (B, 1, L) float32, NCL like PyTorch.
    kp: prepared (permuted / padded / optionally bf16) params from prepare_params.
    """
    assert stride == kernel_size, "kernel assumes non-overlapping conv windows"
    B, c_in, L = x.shape
    assert c_in == 1
    K = kernel_size
    T = (L - K) // stride + 1

    wc, bc, w1p, b1, w2p, b2p = (kp[k] for k in ("wc", "bc", "w1p", "b1", "w2p", "b2p"))
    C = wc.shape[1]
    Hp = w1p.shape[1]
    NP = w2p.shape[1]
    w_dtype = wc.dtype

    if block_b is None:
        block_b = _choose_block_b(B)
    block_b = max(1, min(int(block_b), B))
    nb = pl.cdiv(B, block_b)
    if nb > 1 and block_b % 8 != 0:                 # sublane-tile the block rows
        block_b = ((block_b + 7) // 8) * 8
        nb = pl.cdiv(B, block_b)
    Bp = nb * block_b

    # Free row-major views of x (no transpose); pad batch rows if needed.
    x3 = x[:, 0, : T * stride].reshape(B, T, K).astype(w_dtype)
    if Bp != B:
        x3 = jnp.pad(x3, ((0, Bp - B), (0, 0), (0, 0)))
    weights = (wc, bc, w1p, b1, w2p, b2p)

    def run(fused):
        x_in = x3.reshape(Bp * T, K) if fused else x3.reshape(Bp, T * K)
        fn = _build_call(Bp, block_b, T, K, C, Hp, NP, fused)
        return fn(x_in, *weights)

    key = jnp.dtype(w_dtype).name
    fused_ok = _FUSED_OK.get(key)
    if fused_ok is None:
        try:
            out = jax.block_until_ready(run(True))
            _FUSED_OK[key] = True
        except Exception:                            # Mosaic reshape unsupported
            _FUSED_OK[key] = False
            out = run(False)
    else:
        out = run(fused_ok)
    return out[:B, :n_out]


# --------------------------- parameter handling ----------------------------- #

def init_params(key, *, kernel_size, out_channels, conv_out_len, hidden=64, n_out=2):
    """Deterministic synthetic parameters (shapes mirror the PyTorch module)."""
    K, C, T, H = kernel_size, out_channels, conv_out_len, hidden
    ks = jax.random.split(key, 6)
    return {
        # conv1: torch weight (C, 1, K) -> stored transposed as (K, C)
        "wc": jax.random.normal(ks[0], (K, C), jnp.float32) / jnp.sqrt(K),
        "bc": jax.random.normal(ks[1], (1, C), jnp.float32) * 0.01,
        # fc1: torch weight (H, C*T) -> stored transposed as (C*T, H)
        "w1": jax.random.normal(ks[2], (C * T, H), jnp.float32) / jnp.sqrt(C * T),
        "b1": jax.random.normal(ks[3], (1, H), jnp.float32) * 0.01,
        # fc2: torch weight (2, H) -> stored transposed as (H, 2)
        "w2": jax.random.normal(ks[4], (H, n_out), jnp.float32) / jnp.sqrt(H),
        "b2": jax.random.normal(ks[5], (1, n_out), jnp.float32) * 0.01,
    }


def prepare_params(params, *, conv_out_len, dtype=jnp.float32,
                   hidden_pad=HIDDEN_PAD, n_out_pad=N_OUT_PAD):
    """One-time layout prep.

    * fc1 rows permuted: PyTorch flattens the conv output (B, C, T) channel-major
      (index c*T + t); the kernel emits features window-major (index t*C + c),
      so w1p[t*C + c, :] = w1[c*T + t, :].
    * fc1 cols / b1 zero-padded 64 -> 128 (lane-dense hidden); padded hidden
      units sigmoid to 0.5 but multiply all-zero rows of w2p => exact result.
    * fc2 weight/bias zero-padded to 128 lanes so the final store is lane-dense.
    * Matmul weights optionally cast to bf16 (v6e/v7x); biases stay f32.
    """
    T = conv_out_len
    C = params["wc"].shape[1]
    H = params["w1"].shape[1]
    n_out = params["w2"].shape[1]
    assert hidden_pad >= H and n_out_pad >= n_out
    w1p = params["w1"].reshape(C, T, H).transpose(1, 0, 2).reshape(T * C, H)
    w1p = jnp.zeros((T * C, hidden_pad), jnp.float32).at[:, :H].set(w1p)
    b1p = jnp.zeros((1, hidden_pad), jnp.float32).at[:, :H].set(params["b1"])
    w2p = jnp.zeros((hidden_pad, n_out_pad), jnp.float32).at[:H, :n_out].set(params["w2"])
    b2p = jnp.zeros((1, n_out_pad), jnp.float32).at[:, :n_out].set(params["b2"])
    return {"wc": params["wc"].astype(dtype), "bc": params["bc"].astype(jnp.float32),
            "w1p": w1p.astype(dtype), "b1": b1p,
            "w2p": w2p.astype(dtype), "b2p": b2p}


def reference_forward(x, params, *, kernel_size, stride):
    """Pure-JAX reference of the PyTorch forward (uses the ORIGINAL layouts)."""
    B, _, L = x.shape
    K = kernel_size
    T = (L - K) // stride + 1
    xw = x[:, 0, : T * stride].reshape(B * T, K)
    h = jnp.maximum(xw @ params["wc"] + params["bc"], 0.0)
    flat = h.reshape(B, T, -1).transpose(0, 2, 1).reshape(B, -1)   # channel-major
    z = jax.nn.sigmoid(flat @ params["w1"] + params["b1"])
    return z @ params["w2"] + params["b2"]


# ----------------------------------- main ----------------------------------- #

if __name__ == "__main__":
    # Small config consistent with the module (the config dict allows overriding
    # input_size): input_size=1024, kernel=stride=64 -> T=16 windows,
    # out_channels=64 -> 1024 flattened features, fc1: 1024 -> 64, fc2: 64 -> 2.
    B = 2
    INPUT_SIZE = 1024
    KERNEL_SIZE = 64
    STRIDE = 64
    OUT_CHANNELS = 64
    T = (INPUT_SIZE - KERNEL_SIZE) // STRIDE + 1

    key = jax.random.PRNGKey(0)
    k_x, k_p = jax.random.split(key)
    x = jax.random.normal(k_x, (B, 1, INPUT_SIZE), jnp.float32)
    params = init_params(k_p, kernel_size=KERNEL_SIZE, out_channels=OUT_CHANNELS,
                         conv_out_len=T)
    ref = reference_forward(x, params, kernel_size=KERNEL_SIZE, stride=STRIDE)

    # f32 path (tight parity with the reference).
    kp32 = prepare_params(params, conv_out_len=T, dtype=jnp.float32)
    out32 = jax.block_until_ready(
        model_monitor_forward(x, kp32, kernel_size=KERNEL_SIZE, stride=STRIDE))
    assert out32.shape == (B, 2), f"bad output shape {out32.shape}"
    assert jnp.allclose(out32, ref, atol=1e-4, rtol=1e-4), \
        "Pallas f32 output mismatch vs reference"

    # bf16 weights/activations path (v6e/v7x HBM + MXU rate); f32 accumulation.
    kp16 = prepare_params(params, conv_out_len=T, dtype=jnp.bfloat16)
    out16 = jax.block_until_ready(
        model_monitor_forward(x, kp16, kernel_size=KERNEL_SIZE, stride=STRIDE))
    assert out16.shape == (B, 2), f"bad output shape {out16.shape}"
    assert jnp.allclose(out16, ref, atol=5e-2, rtol=5e-2), \
        "Pallas bf16 output mismatch vs reference"

    print("KERNEL_OK")
</pallas_src>

<mosaic_0001>
module attributes {stable_mosaic.version = 11 : i64} {
  func.func @fused_monitor_kernel(%arg0: i32, %arg1: memref<32x64xf32, #tpu.memory_space<vmem>>, %arg2: memref<64x64xf32, #tpu.memory_space<vmem>>, %arg3: memref<1x64xf32, #tpu.memory_space<vmem>>, %arg4: memref<1024x128xf32, #tpu.memory_space<vmem>>, %arg5: memref<1x128xf32, #tpu.memory_space<vmem>>, %arg6: memref<128x128xf32, #tpu.memory_space<vmem>>, %arg7: memref<1x128xf32, #tpu.memory_space<vmem>>, %arg8: memref<2x128xf32, #tpu.memory_space<vmem>>) attributes {dimension_semantics = [#tpu.dimension_semantics<parallel>], iteration_bounds = array<i64: 1>, scalar_prefetch = 0 : i64, scratch_operands = 0 : i64, tpu.core_type = #tpu.core_type<tc>, window_params = [{transform_indices = @transform_0, window_bounds = array<i64: 32, 64>}, {pipeline_mode = #tpu.pipeline_mode<synchronous>, transform_indices = @transform_1, window_bounds = array<i64: 64, 64>}, {pipeline_mode = #tpu.pipeline_mode<synchronous>, transform_indices = @transform_2, window_bounds = array<i64: 1, 64>}, {pipeline_mode = #tpu.pipeline_mode<synchronous>, transform_indices = @transform_3, window_bounds = array<i64: 1024, 128>}, {pipeline_mode = #tpu.pipeline_mode<synchronous>, transform_indices = @transform_4, window_bounds = array<i64: 1, 128>}, {pipeline_mode = #tpu.pipeline_mode<synchronous>, transform_indices = @transform_5, window_bounds = array<i64: 128, 128>}, {pipeline_mode = #tpu.pipeline_mode<synchronous>, transform_indices = @transform_6, window_bounds = array<i64: 1, 128>}, {transform_indices = @transform_7, window_bounds = array<i64: 2, 128>}]} {
    %c0 = arith.constant 0 : index
    %c0_0 = arith.constant 0 : index
    %0 = vector.load %arg1[%c0, %c0_0] : memref<32x64xf32, #tpu.memory_space<vmem>>, vector<32x64xf32>
    %c0_1 = arith.constant 0 : index
    %c0_2 = arith.constant 0 : index
    %1 = vector.load %arg2[%c0_1, %c0_2] : memref<64x64xf32, #tpu.memory_space<vmem>>, vector<64x64xf32>
    %cst = arith.constant dense<0.000000e+00> : vector<32x64xf32>
    %2 = tpu.matmul %0, %1, %cst {dimension_numbers = #tpu.dot_dimension_numbers<[1], [0], [0], [1], [0, 0, 1, 1], [], []>} : vector<32x64xf32>, vector<64x64xf32>, vector<32x64xf32> -> vector<32x64xf32>
    %c0_3 = arith.constant 0 : index
    %c0_4 = arith.constant 0 : index
    %3 = vector.load %arg3[%c0_3, %c0_4] : memref<1x64xf32, #tpu.memory_space<vmem>>, vector<1x64xf32>
    %4 = vector.broadcast %3 : vector<1x64xf32> to vector<32x64xf32>
    %5 = arith.addf %2, %4 : vector<32x64xf32>
    %cst_5 = arith.constant 0.000000e+00 : f32
    %6 = vector.broadcast %cst_5 : f32 to vector<32x64xf32>
    %7 = arith.maximumf %5, %6 : vector<32x64xf32>
    %8 = vector.shape_cast %7 : vector<32x64xf32> to vector<2x1024xf32>
    %c0_6 = arith.constant 0 : index
    %c0_7 = arith.constant 0 : index
    %9 = vector.load %arg4[%c0_6, %c0_7] : memref<1024x128xf32, #tpu.memory_space<vmem>>, vector<1024x128xf32>
    %cst_8 = arith.constant dense<0.000000e+00> : vector<2x128xf32>
    %10 = tpu.matmul %8, %9, %cst_8 {dimension_numbers = #tpu.dot_dimension_numbers<[1], [0], [0], [1], [0, 0, 1, 1], [], []>} : vector<2x1024xf32>, vector<1024x128xf32>, vector<2x128xf32> -> vector<2x128xf32>
    %c0_9 = arith.constant 0 : index
    %c0_10 = arith.constant 0 : index
    %11 = vector.load %arg5[%c0_9, %c0_10] : memref<1x128xf32, #tpu.memory_space<vmem>>, vector<1x128xf32>
    %12 = vector.broadcast %11 : vector<1x128xf32> to vector<2x128xf32>
    %13 = arith.addf %10, %12 : vector<2x128xf32>
    %14 = arith.negf %13 : vector<2x128xf32>
    %15 = math.exp %14 : vector<2x128xf32>
    %cst_11 = arith.constant 1.000000e+00 : f32
    %16 = vector.broadcast %cst_11 : f32 to vector<2x128xf32>
    %17 = arith.addf %16, %15 : vector<2x128xf32>
    %18 = arith.divf %16, %17 : vector<2x128xf32>
    %c0_12 = arith.constant 0 : index
    %c0_13 = arith.constant 0 : index
    %19 = vector.load %arg6[%c0_12, %c0_13] : memref<128x128xf32, #tpu.memory_space<vmem>>, vector<128x128xf32>
    %cst_14 = arith.constant dense<0.000000e+00> : vector<2x128xf32>
    %20 = tpu.matmul %18, %19, %cst_14 {dimension_numbers = #tpu.dot_dimension_numbers<[1], [0], [0], [1], [0, 0, 1, 1], [], []>} : vector<2x128xf32>, vector<128x128xf32>, vector<2x128xf32> -> vector<2x128xf32>
    %c0_15 = arith.constant 0 : index
    %c0_16 = arith.constant 0 : index
    %21 = vector.load %arg7[%c0_15, %c0_16] : memref<1x128xf32, #tpu.memory_space<vmem>>, vector<1x128xf32>
    %22 = vector.broadcast %21 : vector<1x128xf32> to vector<2x128xf32>
    %23 = arith.addf %20, %22 : vector<2x128xf32>
    %c0_17 = arith.constant 0 : index
    %c0_18 = arith.constant 0 : index
    %24 = vector.load %arg8[%c0_17, %c0_18] : memref<2x128xf32, #tpu.memory_space<vmem>>, vector<2x128xf32>
    tpu.vector_store %arg8[%c0_17, %c0_18], %23 {strides = array<i32>} : memref<2x128xf32, #tpu.memory_space<vmem>>, vector<2x128xf32>,
    return
  }
  func.func @transform_0(%arg0: i32) -> (i32, i32) {
    %c0_i32 = arith.constant 0 : i32
    %c0_i32_0 = arith.constant 0 : i32
    return %arg0, %c0_i32 : i32, i32
  }
  func.func @transform_1(%arg0: i32) -> (i32, i32) {
    %c0_i32 = arith.constant 0 : i32
    %c0_i32_0 = arith.constant 0 : i32
    %c0_i32_1 = arith.constant 0 : i32
    return %c0_i32, %c0_i32_0 : i32, i32
  }
  func.func @transform_2(%arg0: i32) -> (i32, i32) {
    %c0_i32 = arith.constant 0 : i32
    %c0_i32_0 = arith.constant 0 : i32
    %c0_i32_1 = arith.constant 0 : i32
    return %c0_i32, %c0_i32_0 : i32, i32
  }
  func.func @transform_3(%arg0: i32) -> (i32, i32) {
    %c0_i32 = arith.constant 0 : i32
    %c0_i32_0 = arith.constant 0 : i32
    %c0_i32_1 = arith.constant 0 : i32
    return %c0_i32, %c0_i32_0 : i32, i32
  }
  func.func @transform_4(%arg0: i32) -> (i32, i32) {
    %c0_i32 = arith.constant 0 : i32
    %c0_i32_0 = arith.constant 0 : i32
    %c0_i32_1 = arith.constant 0 : i32
    return %c0_i32, %c0_i32_0 : i32, i32
  }
  func.func @transform_5(%arg0: i32) -> (i32, i32) {
    %c0_i32 = arith.constant 0 : i32
    %c0_i32_0 = arith.constant 0 : i32
    %c0_i32_1 = arith.constant 0 : i32
    return %c0_i32, %c0_i32_0 : i32, i32
  }
  func.func @transform_6(%arg0: i32) -> (i32, i32) {
    %c0_i32 = arith.constant 0 : i32
    %c0_i32_0 = arith.constant 0 : i32
    %c0_i32_1 = arith.constant 0 : i32
    return %c0_i32, %c0_i32_0 : i32, i32
  }
  func.func @transform_7(%arg0: i32) -> (i32, i32) {
    %c0_i32 = arith.constant 0 : i32
    %c0_i32_0 = arith.constant 0 : i32
    return %arg0, %c0_i32 : i32, i32
  }
}

module attributes {stable_mosaic.version = 11 : i64} {
  func.func @scratch_monitor_kernel(%arg0: i32, %arg1: memref<2x1024xf32, #tpu.memory_space<vmem>>, %arg2: memref<64x64xf32, #tpu.memory_space<vmem>>, %arg3: memref<1x64xf32, #tpu.memory_space<vmem>>, %arg4: memref<1024x128xf32, #tpu.memory_space<vmem>>, %arg5: memref<1x128xf32, #tpu.memory_space<vmem>>, %arg6: memref<128x128xf32, #tpu.memory_space<vmem>>, %arg7: memref<1x128xf32, #tpu.memory_space<vmem>>, %arg8: memref<2x128xf32, #tpu.memory_space<vmem>>, %arg9: memref<2x1024xf32, #tpu.memory_space<vmem>>) attributes {dimension_semantics = [#tpu.dimension_semantics<parallel>], iteration_bounds = array<i64: 1>, scalar_prefetch = 0 : i64, scratch_operands = 1 : i64, tpu.core_type = #tpu.core_type<tc>, window_params = [{transform_indices = @transform_0, window_bounds = array<i64: 2, 1024>}, {pipeline_mode = #tpu.pipeline_mode<synchronous>, transform_indices = @transform_1, window_bounds = array<i64: 64, 64>}, {pipeline_mode = #tpu.pipeline_mode<synchronous>, transform_indices = @transform_2, window_bounds = array<i64: 1, 64>}, {pipeline_mode = #tpu.pipeline_mode<synchronous>, transform_indices = @transform_3, window_bounds = array<i64: 1024, 128>}, {pipeline_mode = #tpu.pipeline_mode<synchronous>, transform_indices = @transform_4, window_bounds = array<i64: 1, 128>}, {pipeline_mode = #tpu.pipeline_mode<synchronous>, transform_indices = @transform_5, window_bounds = array<i64: 128, 128>}, {pipeline_mode = #tpu.pipeline_mode<synchronous>, transform_indices = @transform_6, window_bounds = array<i64: 1, 128>}, {transform_indices = @transform_7, window_bounds = array<i64: 2, 128>}]} {
    %c0 = arith.constant 0 : index
    %c0_0 = arith.constant 0 : index
    %0 = vector.load %arg2[%c0, %c0_0] : memref<64x64xf32, #tpu.memory_space<vmem>>, vector<64x64xf32>
    %c0_1 = arith.constant 0 : index
    %c0_2 = arith.constant 0 : index
    %1 = vector.load %arg3[%c0_1, %c0_2] : memref<1x64xf32, #tpu.memory_space<vmem>>, vector<1x64xf32>
    %2 = vector.shape_cast %1 : vector<1x64xf32> to vector<1x64xf32>
    %3 = vector.broadcast %2 : vector<1x64xf32> to vector<2x64xf32>
    %c0_3 = arith.constant 0 : index
    %c0_4 = arith.constant 0 : index
    %4 = vector.load %arg1[%c0_3, %c0_4] : memref<2x1024xf32, #tpu.memory_space<vmem>>, vector<2x64xf32>
    %cst = arith.constant dense<0.000000e+00> : vector<2x64xf32>
    %5 = tpu.matmul %4, %0, %cst {dimension_numbers = #tpu.dot_dimension_numbers<[1], [0], [0], [1], [0, 0, 1, 1], [], []>} : vector<2x64xf32>, vector<64x64xf32>, vector<2x64xf32> -> vector<2x64xf32>
    %6 = arith.addf %5, %3 : vector<2x64xf32>
    %cst_5 = arith.constant 0.000000e+00 : f32
    %7 = vector.broadcast %cst_5 : f32 to vector<2x64xf32>
    %8 = arith.maximumf %6, %7 : vector<2x64xf32>
    %c0_6 = arith.constant 0 : index
    %c0_7 = arith.constant 0 : index
    %9 = vector.load %arg9[%c0_6, %c0_7] : memref<2x1024xf32, #tpu.memory_space<vmem>>, vector<2x64xf32>
    tpu.vector_store %arg9[%c0_6, %c0_7], %8 {strides = array<i32>} : memref<2x1024xf32, #tpu.memory_space<vmem>>, vector<2x64xf32>,
    %c0_8 = arith.constant 0 : index
    %c64 = arith.constant 64 : index
    %10 = vector.load %arg1[%c0_8, %c64] : memref<2x1024xf32, #tpu.memory_space<vmem>>, vector<2x64xf32>
    %cst_9 = arith.constant dense<0.000000e+00> : vector<2x64xf32>
    %11 = tpu.matmul %10, %0, %cst_9 {dimension_numbers = #tpu.dot_dimension_numbers<[1], [0], [0], [1], [0, 0, 1, 1], [], []>} : vector<2x64xf32>, vector<64x64xf32>, vector<2x64xf32> -> vector<2x64xf32>
    %12 = arith.addf %11, %3 : vector<2x64xf32>
    %cst_10 = arith.constant 0.000000e+00 : f32
    %13 = vector.broadcast %cst_10 : f32 to vector<2x64xf32>
    %14 = arith.maximumf %12, %13 : vector<2x64xf32>
    %c0_11 = arith.constant 0 : index
    %c64_12 = arith.constant 64 : index
    %15 = vector.load %arg9[%c0_11, %c64_12] : memref<2x1024xf32, #tpu.memory_space<vmem>>, vector<2x64xf32>
    tpu.vector_store %arg9[%c0_11, %c64_12], %14 {strides = array<i32>} : memref<2x1024xf32, #tpu.memory_space<vmem>>, vector<2x64xf32>,
    %c0_13 = arith.constant 0 : index
    %c128 = arith.constant 128 : index
    %16 = vector.load %arg1[%c0_13, %c128] : memref<2x1024xf32, #tpu.memory_space<vmem>>, vector<2x64xf32>
    %cst_14 = arith.constant dense<0.000000e+00> : vector<2x64xf32>
    %17 = tpu.matmul %16, %0, %cst_14 {dimension_numbers = #tpu.dot_dimension_numbers<[1], [0], [0], [1], [0, 0, 1, 1], [], []>} : vector<2x64xf32>, vector<64x64xf32>, vector<2x64xf32> -> vector<2x64xf32>
    %18 = arith.addf %17, %3 : vector<2x64xf32>
    %cst_15 = arith.constant 0.000000e+00 : f32
    %19 = vector.broadcast %cst_15 : f32 to vector<2x64xf32>
    %20 = arith.maximumf %18, %19 : vector<2x64xf32>
    %c0_16 = arith.constant 0 : index
    %c128_17 = arith.constant 128 : index
    %21 = vector.load %arg9[%c0_16, %c128_17] : memref<2x1024xf32, #tpu.memory_space<vmem>>, vector<2x64xf32>
    tpu.vector_store %arg9[%c0_16, %c128_17], %20 {strides = array<i32>} : memref<2x1024xf32, #tpu.memory_space<vmem>>, vector<2x64xf32>,
    %c0_18 = arith.constant 0 : index
    %c192 = arith.constant 192 : index
    %22 = vector.load %arg1[%c0_18, %c192] : memref<2x1024xf32, #tpu.memory_space<vmem>>, vector<2x64xf32>
    %cst_19 = arith.constant dense<0.000000e+00> : vector<2x64xf32>
    %23 = tpu.matmul %22, %0, %cst_19 {dimension_numbers = #tpu.dot_dimension_numbers<[1], [0], [0], [1], [0, 0, 1, 1], [], []>} : vector<2x64xf32>, vector<64x64xf32>, vector<2x64xf32> -> vector<2x64xf32>
    %24 = arith.addf %23, %3 : vector<2x64xf32>
    %cst_20 = arith.constant 0.000000e+00 : f32
    %25 = vector.broadcast %cst_20 : f32 to vector<2x64xf32>
    %26 = arith.maximumf %24, %25 : vector<2x64xf32>
    %c0_21 = arith.constant 0 : index
    %c192_22 = arith.constant 192 : index
    %27 = vector.load %arg9[%c0_21, %c192_22] : memref<2x1024xf32, #tpu.memory_space<vmem>>, vector<2x64xf32>
    tpu.vector_store %arg9[%c0_21, %c192_22], %26 {strides = array<i32>} : memref<2x1024xf32, #tpu.memory_space<vmem>>, vector<2x64xf32>,
    %c0_23 = arith.constant 0 : index
    %c256 = arith.constant 256 : index
    %28 = vector.load %arg1[%c0_23, %c256] : memref<2x1024xf32, #tpu.memory_space<vmem>>, vector<2x64xf32>
    %cst_24 = arith.constant dense<0.000000e+00> : vector<2x64xf32>
    %29 = tpu.matmul %28, %0, %cst_24 {dimension_numbers = #tpu.dot_dimension_numbers<[1], [0], [0], [1], [0, 0, 1, 1], [], []>} : vector<2x64xf32>, vector<64x64xf32>, vector<2x64xf32> -> vector<2x64xf32>
    %30 = arith.addf %29, %3 : vector<2x64xf32>
    %cst_25 = arith.constant 0.000000e+00 : f32
    %31 = vector.broadcast %cst_25 : f32 to vector<2x64xf32>
    %32 = arith.maximumf %30, %31 : vector<2x64xf32>
    %c0_26 = arith.constant 0 : index
    %c256_27 = arith.constant 256 : index
    %33 = vector.load %arg9[%c0_26, %c256_27] : memref<2x1024xf32, #tpu.memory_space<vmem>>, vector<2x64xf32>
    tpu.vector_store %arg9[%c0_26, %c256_27], %32 {strides = array<i32>} : memref<2x1024xf32, #tpu.memory_space<vmem>>, vector<2x64xf32>,
    %c0_28 = arith.constant 0 : index
    %c320 = arith.constant 320 : index
    %34 = vector.load %arg1[%c0_28, %c320] : memref<2x1024xf32, #tpu.memory_space<vmem>>, vector<2x64xf32>
    %cst_29 = arith.constant dense<0.000000e+00> : vector<2x64xf32>
    %35 = tpu.matmul %34, %0, %cst_29 {dimension_numbers = #tpu.dot_dimension_numbers<[1], [0], [0], [1], [0, 0, 1, 1], [], []>} : vector<2x64xf32>, vector<64x64xf32>, vector<2x64xf32> -> vector<2x64xf32>
    %36 = arith.addf %35, %3 : vector<2x64xf32>
    %cst_30 = arith.constant 0.000000e+00 : f32
    %37 = vector.broadcast %cst_30 : f32 to vector<2x64xf32>
    %38 = arith.maximumf %36, %37 : vector<2x64xf32>
    %c0_31 = arith.constant 0 : index
    %c320_32 = arith.constant 320 : index
    %39 = vector.load %arg9[%c0_31, %c320_32] : memref<2x1024xf32, #tpu.memory_space<vmem>>, vector<2x64xf32>
    tpu.vector_store %arg9[%c0_31, %c320_32], %38 {strides = array<i32>} : memref<2x1024xf32, #tpu.memory_space<vmem>>, vector<2x64xf32>,
    %c0_33 = arith.constant 0 : index
    %c384 = arith.constant 384 : index
    %40 = vector.load %arg1[%c0_33, %c384] : memref<2x1024xf32, #tpu.memory_space<vmem>>, vector<2x64xf32>
    %cst_34 = arith.constant dense<0.000000e+00> : vector<2x64xf32>
    %41 = tpu.matmul %40, %0, %cst_34 {dimension_numbers = #tpu.dot_dimension_numbers<[1], [0], [0], [1], [0, 0, 1, 1], [], []>} : vector<2x64xf32>, vector<64x64xf32>, vector<2x64xf32> -> vector<2x64xf32>
    %42 = arith.addf %41, %3 : vector<2x64xf32>
    %cst_35 = arith.constant 0.000000e+00 : f32
    %43 = vector.broadcast %cst_35 : f32 to vector<2x64xf32>
    %44 = arith.maximumf %42, %43 : vector<2x64xf32>
    %c0_36 = arith.constant 0 : index
    %c384_37 = arith.constant 384 : index
    %45 = vector.load %arg9[%c0_36, %c384_37] : memref<2x1024xf32, #tpu.memory_space<vmem>>, vector<2x64xf32>
    tpu.vector_store %arg9[%c0_36, %c384_37], %44 {strides = array<i32>} : memref<2x1024xf32, #tpu.memory_space<vmem>>, vector<2x64xf32>,
    %c0_38 = arith.constant 0 : index
    %c448 = arith.constant 448 : index
    %46 = vector.load %arg1[%c0_38, %c448] : memref<2x1024xf32, #tpu.memory_space<vmem>>, vector<2x64xf32>
    %cst_39 = arith.constant dense<0.000000e+00> : vector<2x64xf32>
    %47 = tpu.matmul %46, %0, %cst_39 {dimension_numbers = #tpu.dot_dimension_numbers<[1], [0], [0], [1], [0, 0, 1, 1], [], []>} : vector<2x64xf32>, vector<64x64xf32>, vector<2x64xf32> -> vector<2x64xf32>
    %48 = arith.addf %47, %3 : vector<2x64xf32>
    %cst_40 = arith.constant 0.000000e+00 : f32
    %49 = vector.broadcast %cst_40 : f32 to vector<2x64xf32>
    %50 = arith.maximumf %48, %49 : vector<2x64xf32>
    %c0_41 = arith.constant 0 : index
    %c448_42 = arith.constant 448 : index
    %51 = vector.load %arg9[%c0_41, %c448_42] : memref<2x1024xf32, #tpu.memory_space<vmem>>, vector<2x64xf32>
    tpu.vector_store %arg9[%c0_41, %c448_42], %50 {strides = array<i32>} : memref<2x1024xf32, #tpu.memory_space<vmem>>, vector<2x64xf32>,
    %c0_43 = arith.constant 0 : index
    %c512 = arith.constant 512 : index
    %52 = vector.load %arg1[%c0_43, %c512] : memref<2x1024xf32, #tpu.memory_space<vmem>>, vector<2x64xf32>
    %cst_44 = arith.constant dense<0.000000e+00> : vector<2x64xf32>
    %53 = tpu.matmul %52, %0, %cst_44 {dimension_numbers = #tpu.dot_dimension_numbers<[1], [0], [0], [1], [0, 0, 1, 1], [], []>} : vector<2x64xf32>, vector<64x64xf32>, vector<2x64xf32> -> vector<2x64xf32>
    %54 = arith.addf %53, %3 : vector<2x64xf32>
    %cst_45 = arith.constant 0.000000e+00 : f32
    %55 = vector.broadcast %cst_45 : f32 to vector<2x64xf32>
    %56 = arith.maximumf %54, %55 : vector<2x64xf32>
    %c0_46 = arith.constant 0 : index
    %c512_47 = arith.constant 512 : index
    %57 = vector.load %arg9[%c0_46, %c512_47] : memref<2x1024xf32, #tpu.memory_space<vmem>>, vector<2x64xf32>
    tpu.vector_store %arg9[%c0_46, %c512_47], %56 {strides = array<i32>} : memref<2x1024xf32, #tpu.memory_space<vmem>>, vector<2x64xf32>,
    %c0_48 = arith.constant 0 : index
    %c576 = arith.constant 576 : index
    %58 = vector.load %arg1[%c0_48, %c576] : memref<2x1024xf32, #tpu.memory_space<vmem>>, vector<2x64xf32>
    %cst_49 = arith.constant dense<0.000000e+00> : vector<2x64xf32>
    %59 = tpu.matmul %58, %0, %cst_49 {dimension_numbers = #tpu.dot_dimension_numbers<[1], [0], [0], [1], [0, 0, 1, 1], [], []>} : vector<2x64xf32>, vector<64x64xf32>, vector<2x64xf32> -> vector<2x64xf32>
    %60 = arith.addf %59, %3 : vector<2x64xf32>
    %cst_50 = arith.constant 0.000000e+00 : f32
    %61 = vector.broadcast %cst_50 : f32 to vector<2x64xf32>
    %62 = arith.maximumf %60, %61 : vector<2x64xf32>
    %c0_51 = arith.constant 0 : index
    %c576_52 = arith.constant 576 : index
    %63 = vector.load %arg9[%c0_51, %c576_52] : memref<2x1024xf32, #tpu.memory_space<vmem>>, vector<2x64xf32>
    tpu.vector_store %arg9[%c0_51, %c576_52], %62 {strides = array<i32>} : memref<2x1024xf32, #tpu.memory_space<vmem>>, vector<2x64xf32>,
    %c0_53 = arith.constant 0 : index
    %c640 = arith.constant 640 : index
    %64 = vector.load %arg1[%c0_53, %c640] : memref<2x1024xf32, #tpu.memory_space<vmem>>, vector<2x64xf32>
    %cst_54 = arith.constant dense<0.000000e+00> : vector<2x64xf32>
    %65 = tpu.matmul %64, %0, %cst_54 {dimension_numbers = #tpu.dot_dimension_numbers<[1], [0], [0], [1], [0, 0, 1, 1], [], []>} : vector<2x64xf32>, vector<64x64xf32>, vector<2x64xf32> -> vector<2x64xf32>
    %66 = arith.addf %65, %3 : vector<2x64xf32>
    %cst_55 = arith.constant 0.000000e+00 : f32
    %67 = vector.broadcast %cst_55 : f32 to vector<2x64xf32>
    %68 = arith.maximumf %66, %67 : vector<2x64xf32>
    %c0_56 = arith.constant 0 : index
    %c640_57 = arith.constant 640 : index
    %69 = vector.load %arg9[%c0_56, %c640_57] : memref<2x1024xf32, #tpu.memory_space<vmem>>, vector<2x64xf32>
    tpu.vector_store %arg9[%c0_56, %c640_57], %68 {strides = array<i32>} : memref<2x1024xf32, #tpu.memory_space<vmem>>, vector<2x64xf32>,
    %c0_58 = arith.constant 0 : index
    %c704 = arith.constant 704 : index
    %70 = vector.load %arg1[%c0_58, %c704] : memref<2x1024xf32, #tpu.memory_space<vmem>>, vector<2x64xf32>
    %cst_59 = arith.constant dense<0.000000e+00> : vector<2x64xf32>
    %71 = tpu.matmul %70, %0, %cst_59 {dimension_numbers = #tpu.dot_dimension_numbers<[1], [0], [0], [1], [0, 0, 1, 1], [], []>} : vector<2x64xf32>, vector<64x64xf32>, vector<2x64xf32> -> vector<2x64xf32>
    %72 = arith.addf %71, %3 : vector<2x64xf32>
    %cst_60 = arith.constant 0.000000e+00 : f32
    %73 = vector.broadcast %cst_60 : f32 to vector<2x64xf32>
    %74 = arith.maximumf %72, %73 : vector<2x64xf32>
    %c0_61 = arith.constant 0 : index
    %c704_62 = arith.constant 704 : index
    %75 = vector.load %arg9[%c0_61, %c704_62] : memref<2x1024xf32, #tpu.memory_space<vmem>>, vector<2x64xf32>
    tpu.vector_store %arg9[%c0_61, %c704_62], %74 {strides = array<i32>} : memref<2x1024xf32, #tpu.memory_space<vmem>>, vector<2x64xf32>,
    %c0_63 = arith.constant 0 : index
    %c768 = arith.constant 768 : index
    %76 = vector.load %arg1[%c0_63, %c768] : memref<2x1024xf32, #tpu.memory_space<vmem>>, vector<2x64xf32>
    %cst_64 = arith.constant dense<0.000000e+00> : vector<2x64xf32>
    %77 = tpu.matmul %76, %0, %cst_64 {dimension_numbers = #tpu.dot_dimension_numbers<[1], [0], [0], [1], [0, 0, 1, 1], [], []>} : vector<2x64xf32>, vector<64x64xf32>, vector<2x64xf32> -> vector<2x64xf32>
    %78 = arith.addf %77, %3 : vector<2x64xf32>
    %cst_65 = arith.constant 0.000000e+00 : f32
    %79 = vector.broadcast %cst_65 : f32 to vector<2x64xf32>
    %80 = arith.maximumf %78, %79 : vector<2x64xf32>
    %c0_66 = arith.constant 0 : index
    %c768_67 = arith.constant 768 : index
    %81 = vector.load %arg9[%c0_66, %c768_67] : memref<2x1024xf32, #tpu.memory_space<vmem>>, vector<2x64xf32>
    tpu.vector_store %arg9[%c0_66, %c768_67], %80 {strides = array<i32>} : memref<2x1024xf32, #tpu.memory_space<vmem>>, vector<2x64xf32>,
    %c0_68 = arith.constant 0 : index
    %c832 = arith.constant 832 : index
    %82 = vector.load %arg1[%c0_68, %c832] : memref<2x1024xf32, #tpu.memory_space<vmem>>, vector<2x64xf32>
    %cst_69 = arith.constant dense<0.000000e+00> : vector<2x64xf32>
    %83 = tpu.matmul %82, %0, %cst_69 {dimension_numbers = #tpu.dot_dimension_numbers<[1], [0], [0], [1], [0, 0, 1, 1], [], []>} : vector<2x64xf32>, vector<64x64xf32>, vector<2x64xf32> -> vector<2x64xf32>
    %84 = arith.addf %83, %3 : vector<2x64xf32>
    %cst_70 = arith.constant 0.000000e+00 : f32
    %85 = vector.broadcast %cst_70 : f32 to vector<2x64xf32>
    %86 = arith.maximumf %84, %85 : vector<2x64xf32>
    %c0_71 = arith.constant 0 : index
    %c832_72 = arith.constant 832 : index
    %87 = vector.load %arg9[%c0_71, %c832_72] : memref<2x1024xf32, #tpu.memory_space<vmem>>, vector<2x64xf32>
    tpu.vector_store %arg9[%c0_71, %c832_72], %86 {strides = array<i32>} : memref<2x1024xf32, #tpu.memory_space<vmem>>, vector<2x64xf32>,
    %c0_73 = arith.constant 0 : index
    %c896 = arith.constant 896 : index
    %88 = vector.load %arg1[%c0_73, %c896] : memref<2x1024xf32, #tpu.memory_space<vmem>>, vector<2x64xf32>
    %cst_74 = arith.constant dense<0.000000e+00> : vector<2x64xf32>
    %89 = tpu.matmul %88, %0, %cst_74 {dimension_numbers = #tpu.dot_dimension_numbers<[1], [0], [0], [1], [0, 0, 1, 1], [], []>} : vector<2x64xf32>, vector<64x64xf32>, vector<2x64xf32> -> vector<2x64xf32>
    %90 = arith.addf %89, %3 : vector<2x64xf32>
    %cst_75 = arith.constant 0.000000e+00 : f32
    %91 = vector.broadcast %cst_75 : f32 to vector<2x64xf32>
    %92 = arith.maximumf %90, %91 : vector<2x64xf32>
    %c0_76 = arith.constant 0 : index
    %c896_77 = arith.constant 896 : index
    %93 = vector.load %arg9[%c0_76, %c896_77] : memref<2x1024xf32, #tpu.memory_space<vmem>>, vector<2x64xf32>
    tpu.vector_store %arg9[%c0_76, %c896_77], %92 {strides = array<i32>} : memref<2x1024xf32, #tpu.memory_space<vmem>>, vector<2x64xf32>,
    %c0_78 = arith.constant 0 : index
    %c960 = arith.constant 960 : index
    %94 = vector.load %arg1[%c0_78, %c960] : memref<2x1024xf32, #tpu.memory_space<vmem>>, vector<2x64xf32>
    %cst_79 = arith.constant dense<0.000000e+00> : vector<2x64xf32>
    %95 = tpu.matmul %94, %0, %cst_79 {dimension_numbers = #tpu.dot_dimension_numbers<[1], [0], [0], [1], [0, 0, 1, 1], [], []>} : vector<2x64xf32>, vector<64x64xf32>, vector<2x64xf32> -> vector<2x64xf32>
    %96 = arith.addf %95, %3 : vector<2x64xf32>
    %cst_80 = arith.constant 0.000000e+00 : f32
    %97 = vector.broadcast %cst_80 : f32 to vector<2x64xf32>
    %98 = arith.maximumf %96, %97 : vector<2x64xf32>
    %c0_81 = arith.constant 0 : index
    %c960_82 = arith.constant 960 : index
    %99 = vector.load %arg9[%c0_81, %c960_82] : memref<2x1024xf32, #tpu.memory_space<vmem>>, vector<2x64xf32>
    tpu.vector_store %arg9[%c0_81, %c960_82], %98 {strides = array<i32>} : memref<2x1024xf32, #tpu.memory_space<vmem>>, vector<2x64xf32>,
    %c0_83 = arith.constant 0 : index
    %c0_84 = arith.constant 0 : index
    %100 = vector.load %arg9[%c0_83, %c0_84] : memref<2x1024xf32, #tpu.memory_space<vmem>>, vector<2x1024xf32>
    %c0_85 = arith.constant 0 : index
    %c0_86 = arith.constant 0 : index
    %101 = vector.load %arg4[%c0_85, %c0_86] : memref<1024x128xf32, #tpu.memory_space<vmem>>, vector<1024x128xf32>
    %cst_87 = arith.constant dense<0.000000e+00> : vector<2x128xf32>
    %102 = tpu.matmul %100, %101, %cst_87 {dimension_numbers = #tpu.dot_dimension_numbers<[1], [0], [0], [1], [0, 0, 1, 1], [], []>} : vector<2x1024xf32>, vector<1024x128xf32>, vector<2x128xf32> -> vector<2x128xf32>
    %c0_88 = arith.constant 0 : index
    %c0_89 = arith.constant 0 : index
    %103 = vector.load %arg5[%c0_88, %c0_89] : memref<1x128xf32, #tpu.memory_space<vmem>>, vector<1x128xf32>
    %104 = vector.broadcast %103 : vector<1x128xf32> to vector<2x128xf32>
    %105 = arith.addf %102, %104 : vector<2x128xf32>
    %106 = arith.negf %105 : vector<2x128xf32>
    %107 = math.exp %106 : vector<2x128xf32>
    %cst_90 = arith.constant 1.000000e+00 : f32
    %108 = vector.broadcast %cst_90 : f32 to vector<2x128xf32>
    %109 = arith.addf %108, %107 : vector<2x128xf32>
    %110 = arith.divf %108, %109 : vector<2x128xf32>
    %c0_91 = arith.constant 0 : index
    %c0_92 = arith.constant 0 : index
    %111 = vector.load %arg6[%c0_91, %c0_92] : memref<128x128xf32, #tpu.memory_space<vmem>>, vector<128x128xf32>
    %cst_93 = arith.constant dense<0.000000e+00> : vector<2x128xf32>
    %112 = tpu.matmul %110, %111, %cst_93 {dimension_numbers = #tpu.dot_dimension_numbers<[1], [0], [0], [1], [0, 0, 1, 1], [], []>} : vector<2x128xf32>, vector<128x128xf32>, vector<2x128xf32> -> vector<2x128xf32>
    %c0_94 = arith.constant 0 : index
    %c0_95 = arith.constant 0 : index
    %113 = vector.load %arg7[%c0_94, %c0_95] : memref<1x128xf32, #tpu.memory_space<vmem>>, vector<1x128xf32>
    %114 = vector.broadcast %113 : vector<1x128xf32> to vector<2x128xf32>
    %115 = arith.addf %112, %114 : vector<2x128xf32>
    %c0_96 = arith.constant 0 : index
    %c0_97 = arith.constant 0 : index
    %116 = vector.load %arg8[%c0_96, %c0_97] : memref<2x128xf32, #tpu.memory_space<vmem>>, vector<2x128xf32>
    tpu.vector_store %arg8[%c0_96, %c0_97], %115 {strides = array<i32>} : memref<2x128xf32, #tpu.memory_space<vmem>>, vector<2x128xf32>,
    return
  }
  func.func @transform_0(%arg0: i32) -> (i32, i32) {
    %c0_i32 = arith.constant 0 : i32
    %c0_i32_0 = arith.constant 0 : i32
    return %arg0, %c0_i32 : i32, i32
  }
  func.func @transform_1(%arg0: i32) -> (i32, i32) {
    %c0_i32 = arith.constant 0 : i32
    %c0_i32_0 = arith.constant 0 : i32
    %c0_i32_1 = arith.constant 0 : i32
    return %c0_i32, %c0_i32_0 : i32, i32
  }
  func.func @transform_2(%arg0: i32) -> (i32, i32) {
    %c0_i32 = arith.constant 0 : i32
    %c0_i32_0 = arith.constant 0 : i32
    %c0_i32_1 = arith.constant 0 : i32
    return %c0_i32, %c0_i32_0 : i32, i32
  }
  func.func @transform_3(%arg0: i32) -> (i32, i32) {
    %c0_i32 = arith.constant 0 : i32
    %c0_i32_0 = arith.constant 0 : i32
    %c0_i32_1 = arith.constant 0 : i32
    return %c0_i32, %c0_i32_0 : i32, i32
  }
  func.func @transform_4(%arg0: i32) -> (i32, i32) {
    %c0_i32 = arith.constant 0 : i32
    %c0_i32_0 = arith.constant 0 : i32
    %c0_i32_1 = arith.constant 0 : i32
    return %c0_i32, %c0_i32_0 : i32, i32
  }
  func.func @transform_5(%arg0: i32) -> (i32, i32) {
    %c0_i32 = arith.constant 0 : i32
    %c0_i32_0 = arith.constant 0 : i32
    %c0_i32_1 = arith.constant 0 : i32
    return %c0_i32, %c0_i32_0 : i32, i32
  }
  func.func @transform_6(%arg0: i32) -> (i32, i32) {
    %c0_i32 = arith.constant 0 : i32
    %c0_i32_0 = arith.constant 0 : i32
    %c0_i32_1 = arith.constant 0 : i32
    return %c0_i32, %c0_i32_0 : i32, i32
  }
  func.func @transform_7(%arg0: i32) -> (i32, i32) {
    %c0_i32 = arith.constant 0 : i32
    %c0_i32_0 = arith.constant 0 : i32
    return %arg0, %c0_i32 : i32, i32
  }
}

</mosaic_0001>

<bundles_post_ra>
// kernel: tpu_custom_call.1
= control target key start
LH: loop header
LB: loop body
LE: loop exit
PB: predicated region body
PF: predicated region fallthrough
CT: control target
= control target key end

     0   :  { %12 = vsyncpa [#allocation4], 0  ;;  %s1419_s0 = inlined_call_operand.hbm [shape: f32[2,1024], index: 0, kind: input, shape index: {}]   ;;  %s1420_s1 = inlined_call_operand.hbm [shape: f32[64,64], index: 1, kind: input, shape index: {}]   ;;  %s1421_s2 = inlined_call_operand.vmem [shape: f32[1,64], index: 2, kind: input, shape index: {}]   ;;  %s1422_s3 = inlined_call_operand.hbm [shape: f32[1024,128], index: 3, kind: input, shape index: {}]   ;;  %s1423_s4 = inlined_call_operand.vmem [shape: f32[1,128], index: 4, kind: input, shape index: {}]   ;;  %s1424_s5 = inlined_call_operand.hbm [shape: f32[128,128], index: 5, kind: input, shape index: {}]   ;;  %s1425_s6 = inlined_call_operand.vmem [shape: f32[1,128], index: 6, kind: input, shape index: {}]   ;;  %s1426_s7 = inlined_call_operand.hbm [shape: f32[2,128], index: 7, kind: output, shape index: {}]  }
   0x1   :  { %13 = vsyncpa [#allocation7], 0 }
   0x2   :  { %14 = vsyncpa [#allocation10], 0  ;;  %s31_s26 = sshll.u32 %s1420_s1, 4  ;;  %s32_s26 = int_to_ptr.hbm [resolvable:$true] %s31_s26 }
   0x3   :  { %15 = vsyncpa [#allocation5], 0  ;;  %s1137_s27 = smov [#allocation6]   ;;  %s21_s8 = sshll.u32 %s1419_s0, 4  ;;  %s22_s8 = int_to_ptr.hbm [resolvable:$true] %s21_s8 }
   0x4   :  { %s33_s28 = sshll.u32 %s1137_s27, 4  ;;  %s1138_s9 = smov 128   ;;  %s34_s28 = int_to_ptr.vmem [resolvable:$true] %s33_s28 }
   0x5   :  { %s1139_s10 = smov 8   ;;  %s1140_s11 = smov [#allocation3]  }
   0x6   :  { %39 = dma.hbm_to_vmem [thread:$0]  %s32_s26, 1024, %s34_s28, [#allocation7], %s1138_s9, %s1138_s9, %s1139_s10  }
   0x7   :  { %s23_s12 = sshll.u32 %s1140_s11, 4  ;;  %s46_s15 = sshll.u32 %s1422_s3, 4  ;;  %s24_s12 = int_to_ptr.vmem [resolvable:$true] %s23_s12  ;;  %s47_s15 = int_to_ptr.hbm [resolvable:$true] %s46_s15 }
   0x8   :  { %26 = dma.hbm_to_vmem [thread:$0]  %s22_s8, 256, %s24_s12, [#allocation4]  }
   0x9   :  { %s61_s17 = sshll.u32 %s1424_s5, 4  ;;  %s1141_s18 = smov [#allocation8]   ;;  %s62_s17 = int_to_ptr.hbm [resolvable:$true] %s61_s17 }
   0xa   :  { %s48_s19 = sshll.u32 %s1141_s18, 4  ;;  %s1142_s0 = smov [#allocation9]   ;;  %s49_s19 = int_to_ptr.vmem [resolvable:$true] %s48_s19 }
   0xb   :  { %54 = dma.hbm_to_vmem [thread:$0]  %s47_s15, 16384, %s49_s19, [#allocation7], %s1138_s9, %s1138_s9, %s1139_s10  }
   0xc   :  { %s63_s20 = sshll.u32 %s1142_s0, 4  ;;  %s64_s20 = int_to_ptr.vmem [resolvable:$true] %s63_s20 }
   0xd   :  { %69 = dma.hbm_to_vmem [thread:$0]  %s62_s17, 2048, %s64_s20, [#allocation10], %s1138_s9, %s1138_s9, %s1139_s10  }
   0xe   :  { %1129 = dma.done.wait [#allocation4], 256  }
   0xf   :  { %1130 = vsyncadd [#allocation4], 4294967040 }
  0x10   :  { %1131 = dma.done.wait [#allocation7], 17408  }
  0x11   :  { %1132 = vsyncadd [#allocation7], 4294949888 }
  0x12   :  { %1133 = dma.done.wait [#allocation10], 2048  }
  0x13   :  { %1134 = vsyncadd [#allocation10], 4294965248  ;;  %v128_v0 = vld [vmem:[#allocation3] sm:$0x3]  ;;  %v189_v1 = vld [vmem:[#allocation3 + $0x2] sm:$0x3] }
  0x14   :  { %130 = vst [vmem:[#allocation1] ss:$4 sm:$0xff] %v128_v0  ;;  %v249_v3 = vld [vmem:[#allocation3 + $0x4] sm:$0x3]  ;;  %s1143_s3 = smov 64   ;;  %v1200_v9 = vld [vmem:[#allocation6 + $0x38] sm:$0xff] }
  0x15   :  { %v309_v5 = vld [vmem:[#allocation3 + $0x6] sm:$0x3]  ;;  %v369_v7 = vld [vmem:[#allocation3 + $0x8] sm:$0x3]  ;;  %113 = vmatpush.msra.mxu1 %v1200_v9  ;;  %205 = vmatpush.msra.mxu3 %v1200_v9  ;;  %v1206_v11 = vld [vmem:[#allocation6 + $0x28] sm:$0xff]  ;;  %vm101_vm0 = vcmask 523264  }
  0x16   :  { %v1202_v10 = vld [vmem:[#allocation6 + $0x30] sm:$0xff]  ;;  %175 = vmatpush.msra.mxu2 %v1200_v9  ;;  %235 = vmatpush.msra.mxu0 %v1200_v9  ;;  %v1212_v12 = vld [vmem:[#allocation6 + $0x20] sm:$0xff]  ;;  %v429_v13 = vld [vmem:[#allocation3 + $0xa] sm:$0x3]  ;;  %vm126_vm1 = vcmask 517120   ;;  %vm161_vm2 = vcmask 1041920  }
  0x17   :  { %114 = vmatpush.msra.mxu1 %v1202_v10  ;;  %206 = vmatpush.msra.mxu3 %v1202_v10  ;;  %v1218_v14 = vld [vmem:[#allocation6 + $0x18] sm:$0xff]  ;;  %v1225_v16 = vld [vmem:[#allocation6 + $0x10] sm:$0xff]  ;;  %v1230_v17 = vld [vmem:[#allocation6 + $0x8] sm:$0xff]  ;;  %s1144_s24 = smov [#allocation11]   ;;  %s965_s28 = sshll.u32 %s1426_s7, 4  ;;  %s966_s28 = int_to_ptr.hbm [resolvable:$true] %s965_s28 }
  0x18   :  { %176 = vmatpush.msra.mxu2 %v1202_v10  ;;  %236 = vmatpush.msra.mxu0 %v1202_v10  ;;  %v1236_v18 = vld [vmem:[#allocation6] sm:$0xff]  ;;  %v489_v19 = vld [vmem:[#allocation3 + $0xc] sm:$0x3]  ;;  %v549_v21 = vld [vmem:[#allocation3 + $0xe] sm:$0x3]  ;;  %s963_s25 = sshll.u32 %s1144_s24, 4  ;;  %s964_s25 = int_to_ptr.vmem [resolvable:$true] %s963_s25 }
  0x19   :  { %115 = vmatpush.msra.mxu1 %v1206_v11  ;;  %207 = vmatpush.msra.mxu3 %v1206_v11  ;;  %v100_v24 = vld [vmem:[#allocation3] sm:$0x3]  ;;  %v163_v28 = vld [vmem:[#allocation3 + $0x2] sm:$0x3]  ;;  %v283_v31 = vld [vmem:[#allocation3 + $0x6] sm:$0x3] }
  0x1a   :  { %177 = vmatpush.msra.mxu2 %v1206_v11  ;;  %237 = vmatpush.msra.mxu0 %v1206_v11  ;;  %v223_v35 = vld [vmem:[#allocation3 + $0x4] sm:$0x3]  ;;  %v1364_v36 = vld [vmem:[%s1421_s2] ss:$0 sm:$0xff]  ;;  %v403_v40 = vld [vmem:[#allocation3 + $0xa] sm:$0x3] }
  0x1b   :  { %v131_v2 = vld.sshfl [vmem:[#allocation1] sm:$0xff pattern:$0x73625140]  ;;  %116 = vmatpush.msra.mxu1 %v1212_v12  ;;  %208 = vmatpush.msra.mxu3 %v1212_v12 }
  0x1c   :  { %191 = vst [vmem:[#allocation1] ss:$4 sm:$0xff] %v189_v1  ;;  %178 = vmatpush.msra.mxu2 %v1212_v12  ;;  %238 = vmatpush.msra.mxu0 %v1212_v12  ;;  %v343_v41 = vld [vmem:[#allocation3 + $0x8] sm:$0x3]  ;;  %v523_v42 = vld [vmem:[#allocation3 + $0xe] sm:$0x3] }
  0x1d   :  { %117 = vmatpush.msra.mxu1 %v1218_v14  ;;  %209 = vmatpush.msra.mxu3 %v1218_v14  ;;  %v463_v43 = vld [vmem:[#allocation3 + $0xc] sm:$0x3] }
  0x1e   :  { %179 = vmatpush.msra.mxu2 %v1218_v14  ;;  %239 = vmatpush.msra.mxu0 %v1218_v14 }
  0x1f   :  { %118 = vmatpush.msra.mxu1 %v1225_v16  ;;  %210 = vmatpush.msra.mxu3 %v1225_v16 }
  0x20   :  { %180 = vmatpush.msra.mxu2 %v1225_v16  ;;  %240 = vmatpush.msra.mxu0 %v1225_v16 }
  0x21   :  { %119 = vmatpush.msra.mxu1 %v1230_v17  ;;  %211 = vmatpush.msra.mxu3 %v1230_v17 }
  0x22   :  { %181 = vmatpush.msra.mxu2 %v1230_v17  ;;  %241 = vmatpush.msra.mxu0 %v1230_v17 }
  0x23   :  { %v192_v4 = vld.sshfl [vmem:[#allocation1] sm:$0xff pattern:$0x73625140]  ;;  %120 = vmatpush.msra.mxu1 %v1236_v18  ;;  %212 = vmatpush.msra.mxu3 %v1236_v18 }
  0x24   :  { %193 = vrot.lane.b32.xlu0 %v192_v4, %s1143_s3  ;;  %251 = vst [vmem:[#allocation1] ss:$4 sm:$0xff] %v249_v3  ;;  %182 = vmatpush.msra.mxu2 %v1236_v18 }
  0x25   :  { %144 = vmatpush.msrb.mxu1 %v1200_v9  ;;  %325 = vmatpush.msrb.mxu3 %v1200_v9 }
  0x26   :  { %295 = vmatpush.msrb.mxu2 %v1200_v9  ;;  %242 = vmatpush.msra.mxu0 %v1236_v18 }
  0x27   :  { %145 = vmatpush.msrb.mxu1 %v1202_v10  ;;  %326 = vmatpush.msrb.mxu3 %v1202_v10 }
  0x28   :  { %296 = vmatpush.msrb.mxu2 %v1202_v10  ;;  %355 = vmatpush.msrb.mxu0 %v1200_v9 }
  0x29   :  { %146 = vmatpush.msrb.mxu1 %v1206_v11  ;;  %327 = vmatpush.msrb.mxu3 %v1206_v11 }
  0x2a   :  { %297 = vmatpush.msrb.mxu2 %v1206_v11  ;;  %356 = vmatpush.msrb.mxu0 %v1202_v10 }
  0x2b   :  { %v252_v6 = vld.sshfl [vmem:[#allocation1] sm:$0xff pattern:$0x73625140]  ;;  %147 = vmatpush.msrb.mxu1 %v1212_v12  ;;  %328 = vmatpush.msrb.mxu3 %v1212_v12 }
  0x2c   :  { %311 = vst [vmem:[#allocation1] ss:$4 sm:$0xff] %v309_v5  ;;  %132 = vrot.lane.b32.xlu0 %v131_v2, %s1143_s3  ;;  %298 = vmatpush.msrb.mxu2 %v1212_v12 }
  0x2d   :  { %148 = vmatpush.msrb.mxu1 %v1218_v14  ;;  %329 = vmatpush.msrb.mxu3 %v1218_v14 }
  0x2e   :  { %299 = vmatpush.msrb.mxu2 %v1218_v14  ;;  %357 = vmatpush.msrb.mxu0 %v1206_v11 }
  0x2f   :  { %149 = vmatpush.msrb.mxu1 %v1225_v16  ;;  %330 = vmatpush.msrb.mxu3 %v1225_v16 }
  0x30   :  { %300 = vmatpush.msrb.mxu2 %v1225_v16  ;;  %358 = vmatpush.msrb.mxu0 %v1212_v12 }
  0x31   :  { %150 = vmatpush.msrb.mxu1 %v1230_v17  ;;  %331 = vmatpush.msrb.mxu3 %v1230_v17 }
  0x32   :  { %301 = vmatpush.msrb.mxu2 %v1230_v17  ;;  %359 = vmatpush.msrb.mxu0 %v1218_v14 }
  0x33   :  { %v312_v8 = vld.sshfl [vmem:[#allocation1] sm:$0xff pattern:$0x73625140]  ;;  %151 = vmatpush.msrb.mxu1 %v1236_v18  ;;  %332 = vmatpush.msrb.mxu3 %v1236_v18 }
  0x34   :  { %313 = vrot.lane.b32.xlu1 %v312_v8, %s1143_s3  ;;  %371 = vst [vmem:[#allocation1] ss:$4 sm:$0xff] %v369_v7  ;;  %302 = vmatpush.msrb.mxu2 %v1236_v18  ;;  %v600_v8 = vld [vmem:[#allocation8 + $0x78] sm:$0xff] }
  0x35   :  { %360 = vmatpush.msrb.mxu0 %v1225_v16  ;;  %977 = vmatmul.msk.f32.vlgmr.msra.gmra.mxu1 %vm101_vm0, %v100_v24  ;;  %v613_v24 = vld [vmem:[#allocation8 + $0xe0] sm:$0xff] }
  0x36   :  { %265 = vmatpush.msra.mxu1 %v1200_v9  ;;  %979 = vmatmul.msk.f32.vlgmr.msra.gmra.mxu2 %vm101_vm0, %v163_v28  ;;  %v596_v28 = vld [vmem:[#allocation8 + $0x58] sm:$0xff] }
  0x37   :  { %361 = vmatpush.msrb.mxu0 %v1230_v17  ;;  %415 = vmatpush.msra.mxu2 %v1200_v9 }
  0x38   :  { %266 = vmatpush.msra.mxu1 %v1202_v10  ;;  %981 = vmatmul.msk.f32.vlgmr.msra.gmra.mxu0 %vm101_vm0, %v223_v35  ;;  %v627_v35 = vld [vmem:[#allocation8 + $0x150] sm:$0xff] }
  0x39   :  { %362 = vmatpush.msrb.mxu0 %v1236_v18  ;;  %416 = vmatpush.msra.mxu2 %v1202_v10 }
  0x3a   :  { %267 = vmatpush.msra.mxu1 %v1206_v11 }
  0x3b   :  { %v372_v15 = vld.sshfl [vmem:[#allocation1] sm:$0xff pattern:$0x73625140]  ;;  %417 = vmatpush.msra.mxu2 %v1206_v11  ;;  %475 = vmatpush.msra.mxu0 %v1200_v9 }
  0x3c   :  { %431 = vst [vmem:[#allocation1] ss:$4 sm:$0xff] %v429_v13  ;;  %253 = vrot.lane.b32.xlu1 %v252_v6, %s1143_s3  ;;  %268 = vmatpush.msra.mxu1 %v1212_v12  ;;  %v599_v13 = vld [vmem:[#allocation8 + $0x70] sm:$0xff] }
  0x3d   :  { %418 = vmatpush.msra.mxu2 %v1212_v12  ;;  %476 = vmatpush.msra.mxu0 %v1202_v10 }
  0x3e   :  { %269 = vmatpush.msra.mxu1 %v1218_v14  ;;  %983 = vmatmul.msk.f32.vlgmr.msrb.gmra.mxu2 %vm101_vm0, %v283_v31  ;;  %v644_v31 = vld [vmem:[#allocation8 + $0x1d8] sm:$0xff] }
  0x3f   :  { %419 = vmatpush.msra.mxu2 %v1218_v14  ;;  %477 = vmatpush.msra.mxu0 %v1206_v11 }
  0x40   :  { %270 = vmatpush.msra.mxu1 %v1225_v16  ;;  %985 = vmatmul.msk.f32.vlgmr.msrb.gmra.mxu0 %vm101_vm0, %v343_v41  ;;  %v642_v41 = vld [vmem:[#allocation8 + $0x1c8] sm:$0xff] }
  0x41   :  { %420 = vmatpush.msra.mxu2 %v1225_v16  ;;  %478 = vmatpush.msra.mxu0 %v1212_v12 }
  0x42   :  { %271 = vmatpush.msra.mxu1 %v1230_v17 }
  0x43   :  { %v432_v20 = vld.sshfl [vmem:[#allocation1] sm:$0xff pattern:$0x73625140]  ;;  %421 = vmatpush.msra.mxu2 %v1230_v17  ;;  %479 = vmatpush.msra.mxu0 %v1218_v14 }
  0x44   :  { %491 = vst [vmem:[#allocation1] ss:$4 sm:$0xff] %v489_v19  ;;  %433 = vrot.lane.b32.xlu2 %v432_v20, %s1143_s3  ;;  %272 = vmatpush.msra.mxu1 %v1236_v18  ;;  %v614_v19 = vld [vmem:[#allocation8 + $0xe8] sm:$0xff] }
  0x45   :  { %422 = vmatpush.msra.mxu2 %v1236_v18  ;;  %480 = vmatpush.msra.mxu0 %v1225_v16  ;;  %v630_v20 = vld [vmem:[#allocation8 + $0x168] sm:$0xff] }
  0x46   :  { %987 = vmatmul.msk.f32.vlgmr.msra.gmra.mxu2 %vm101_vm0, %v403_v40  ;;  %v626_v40 = vld [vmem:[#allocation8 + $0x148] sm:$0xff] }
  0x47   :  { %535 = vmatpush.msrb.mxu2 %v1200_v9  ;;  %481 = vmatpush.msra.mxu0 %v1230_v17 }
  0x49   :  { %536 = vmatpush.msrb.mxu2 %v1202_v10  ;;  %482 = vmatpush.msra.mxu0 %v1236_v18 }
  0x4a   :  { %989 = vmatmul.msk.f32.vlgmr.msra.gmra.mxu0 %vm101_vm0, %v463_v43  ;;  %v609_v43 = vld [vmem:[#allocation8 + $0xc0] sm:$0xff] }
  0x4b   :  { %v492_v22 = vld.sshfl [vmem:[#allocation1] sm:$0xff pattern:$0x73625140]  ;;  %537 = vmatpush.msrb.mxu2 %v1206_v11  ;;  %738 = vmatpush.msrb.mxu0 %v600_v8  ;;  %v586_v8 = vld [vmem:[#allocation8 + $0x8] sm:$0xff] }
  0x4c   :  { %551 = vst [vmem:[#allocation1] ss:$4 sm:$0xff] %v549_v21  ;;  %373 = vrot.lane.b32.xlu2 %v372_v15, %s1143_s3  ;;  %493 = vrot.lane.b32.xlu1 %v492_v22, %s1143_s3  ;;  %v631_v15 = vld [vmem:[#allocation8 + $0x170] sm:$0xff]  ;;  %v646_v22 = vld [vmem:[#allocation8 + $0x1e8] sm:$0xff] }
  0x4d   :  { %538 = vmatpush.msrb.mxu2 %v1212_v12  ;;  %739 = vmatpush.msrb.mxu0 %v599_v13  ;;  %v601_v13 = vld [vmem:[#allocation8 + $0x80] sm:$0xff] }
  0x4f   :  { %539 = vmatpush.msrb.mxu2 %v1218_v14 }
  0x51   :  { %540 = vmatpush.msrb.mxu2 %v1225_v16 }
  0x53   :  { %v552_v23 = vld.sshfl [vmem:[#allocation1] sm:$0xff pattern:$0x73625140]  ;;  %541 = vmatpush.msrb.mxu2 %v1230_v17 }
  0x54   :  { %553 = vrot.lane.b32.xlu0 %v552_v23, %s1143_s3  ;;  %v597_v23 = vld [vmem:[#allocation8 + $0x60] sm:$0xff] }
  0x55   :  { %542 = vmatpush.msrb.mxu2 %v1236_v18 }
  0x56   :  { %991 = vmatmul.msk.f32.vlgmr.msrb.gmra.mxu2 %vm101_vm0, %v523_v42  ;;  %v593_v42 = vld [vmem:[#allocation8 + $0x40] sm:$0xff] }
  0x96   :  { %v194_v25 = vpop.permute.xlu0 %193 }
  0x97   :  { %980 = vmatmul.msk.f32.vlgmr.msra.gmra.mxu3 %vm101_vm0, %v194_v25 }
  0x98   :  { %445 = vmatpush.msra.mxu3 %v1200_v9 }
  0x9a   :  { %446 = vmatpush.msra.mxu3 %v1202_v10 }
  0x9c   :  { %447 = vmatpush.msra.mxu3 %v1206_v11 }
  0x9e   :  { %v133_v26 = vpop.permute.xlu0 %132  ;;  %448 = vmatpush.msra.mxu3 %v1212_v12  ;;  %v434_v29 = vpop.permute.xlu2 %433 }
  0x9f   :  { %978 = vmatmul.msk.f32.vlgmr.msrb.gmra.mxu1 %vm101_vm0, %v133_v26  ;;  %v629_v26 = vld [vmem:[#allocation8 + $0x160] sm:$0xff] }
  0xa0   :  { %449 = vmatpush.msra.mxu3 %v1218_v14  ;;  %385 = vmatpush.msrb.mxu1 %v1200_v9 }
  0xa2   :  { %450 = vmatpush.msra.mxu3 %v1225_v16  ;;  %386 = vmatpush.msrb.mxu1 %v1202_v10 }
  0xa4   :  { %451 = vmatpush.msra.mxu3 %v1230_v17  ;;  %387 = vmatpush.msrb.mxu1 %v1206_v11 }
  0xa6   :  { %v314_v27 = vpop.permute.xlu1 %313  ;;  %452 = vmatpush.msra.mxu3 %v1236_v18  ;;  %388 = vmatpush.msrb.mxu1 %v1212_v12  ;;  %v374_v32 = vpop.permute.xlu2 %373 }
  0xa7   :  { %984 = vmatmul.msk.f32.vlgmr.msrb.gmra.mxu3 %vm101_vm0, %v314_v27  ;;  %v645_v27 = vld [vmem:[#allocation8 + $0x1e0] sm:$0xff] }
  0xa8   :  { %565 = vmatpush.msrb.mxu3 %v1200_v9  ;;  %389 = vmatpush.msrb.mxu1 %v1218_v14 }
  0xaa   :  { %566 = vmatpush.msrb.mxu3 %v1202_v10  ;;  %390 = vmatpush.msrb.mxu1 %v1225_v16 }
  0xac   :  { %567 = vmatpush.msrb.mxu3 %v1206_v11  ;;  %391 = vmatpush.msrb.mxu1 %v1230_v17 }
  0xae   :  { %v254_v30 = vpop.permute.xlu1 %253  ;;  %568 = vmatpush.msrb.mxu3 %v1212_v12  ;;  %392 = vmatpush.msrb.mxu1 %v1236_v18 }
  0xaf   :  { %982 = vmatmul.msk.f32.vlgmr.msra.gmra.mxu1 %vm101_vm0, %v254_v30  ;;  %988 = vmatmul.msk.f32.vlgmr.msra.gmra.mxu3 %vm101_vm0, %v434_v29  ;;  %v612_v29 = vld [vmem:[#allocation8 + $0xd8] sm:$0xff] }
  0xb0   :  { %569 = vmatpush.msrb.mxu3 %v1218_v14  ;;  %505 = vmatpush.msra.mxu1 %v1200_v9  ;;  %v616_v9 = vld [vmem:[#allocation8 + $0xf8] sm:$0xff] }
  0xb1   :  { %v628_v30 = vld [vmem:[#allocation8 + $0x158] sm:$0xff] }
  0xb2   :  { %570 = vmatpush.msrb.mxu3 %v1225_v16  ;;  %506 = vmatpush.msra.mxu1 %v1202_v10  ;;  %v122_v37 = vpop.f32.mrf.mxu1  ;;  %v632_v10 = vld [vmem:[#allocation8 + $0x178] sm:$0xff] }
  0xb3   :  { %v123_v38 = vadd.f32 %v1364_v36, %v122_v37  ;;  %778 = vmatpush.msra.mxu2 %v632_v10  ;;  %v643_v37 = vld [vmem:[#allocation8 + $0x1d0] sm:$0xff]  ;;  %v618_v10 = vld [vmem:[#allocation8 + $0x108] sm:$0xff] }
  0xb4   :  { %571 = vmatpush.msrb.mxu3 %v1230_v17  ;;  %507 = vmatpush.msra.mxu1 %v1206_v11 }
  0xb5   :  { %v125_v39 = vmax.f32 %v123_v38, 0.0  ;;  %779 = vmatpush.msra.mxu2 %v631_v15  ;;  %v244_v21 = vpop.f32.mrf.mxu0  ;;  %v594_v38 = vld [vmem:[#allocation8 + $0x48] sm:$0xff]  ;;  %v617_v15 = vld [vmem:[#allocation8 + $0x100] sm:$0xff] }
  0xb6   :  { %572 = vmatpush.msrb.mxu3 %v1236_v18  ;;  %508 = vmatpush.msra.mxu1 %v1212_v12  ;;  %v648_v12 = vld [vmem:[#allocation8 + $0x1f8] sm:$0xff]  ;;  %v245_v25 = vadd.f32 %v1364_v36, %v244_v21 }
  0xb7   :  { %986 = vmatmul.msk.f32.vlgmr.msrb.gmra.mxu1 %vm101_vm0, %v374_v32  ;;  %127 = vst.msk [vmem:[#allocation2] sm:$0x3] %vm126_vm1, %v125_v39  ;;  %780 = vmatpush.msra.mxu2 %v630_v20  ;;  %v610_v39 = vld [vmem:[#allocation8 + $0xc8] sm:$0xff]  ;;  %v680_v20 = vld [vmem:[#allocation8 + $0x2f8] sm:$0xff] }
  0xb8   :  { %509 = vmatpush.msra.mxu1 %v1218_v14  ;;  %v615_v14 = vld [vmem:[#allocation8 + $0xf0] sm:$0xff]  ;;  %798 = vmatpush.msra.mxu3 %v648_v12  ;;  %v247_v32 = vmax.f32 %v245_v25, 0.0  ;;  %v585_v12 = vld [vmem:[#allocation8] sm:$0xff] }
  0xb9   :  { %v184_v56 = vpop.f32.mrf.mxu2  ;;  %781 = vmatpush.msra.mxu2 %v629_v26 }
  0xba   :  { %510 = vmatpush.msra.mxu1 %v1225_v16  ;;  %v185_v57 = vadd.f32 %v1364_v36, %v184_v56  ;;  %v647_v16 = vld [vmem:[#allocation8 + $0x1f0] sm:$0xff]  ;;  %248 = vst.msk [vmem:[#allocation2 + $0x4] sm:$0x3] %vm126_vm1, %v247_v32  ;;  %v606_v56 = vld [vmem:[#allocation8 + $0xa8] sm:$0xff] }
  0xbb   :  { %799 = vmatpush.msra.mxu3 %v647_v16  ;;  %782 = vmatpush.msra.mxu2 %v628_v30  ;;  %v633_v16 = vld [vmem:[#allocation8 + $0x180] sm:$0xff]  ;;  %v711_v30 = vld [vmem:[#allocation8 + $0x3f0] sm:$0xff]  ;;  %v678_v32 = vld [vmem:[#allocation8 + $0x2e8] sm:$0xff] }
  0xbc   :  { %511 = vmatpush.msra.mxu1 %v1230_v17  ;;  %v187_v59 = vmax.f32 %v185_v57, 0.0  ;;  %v622_v57 = vld [vmem:[#allocation8 + $0x128] sm:$0xff] }
  0xbd   :  { %800 = vmatpush.msra.mxu3 %v646_v22  ;;  %783 = vmatpush.msra.mxu2 %v627_v35  ;;  %v696_v22 = vld [vmem:[#allocation8 + $0x378] sm:$0xff]  ;;  %v661_v35 = vld [vmem:[#allocation8 + $0x260] sm:$0xff] }
  0xbe   :  { %v494_v33 = vpop.permute.xlu1 %493  ;;  %512 = vmatpush.msra.mxu1 %v1236_v18  ;;  %188 = vst.msk [vmem:[#allocation2 + $0x2] sm:$0x3] %vm126_vm1, %v187_v59  ;;  %v598_v18 = vld [vmem:[#allocation8 + $0x68] sm:$0xff] }
  0xbf   :  { %990 = vmatmul.msk.f32.vlgmr.msra.gmra.mxu1 %vm101_vm0, %v494_v33  ;;  %740 = vmatpush.msrb.mxu0 %v598_v18  ;;  %v595_v33 = vld [vmem:[#allocation8 + $0x50] sm:$0xff] }
  0xc0   :  { %758 = vmatpush.msrb.mxu1 %v616_v9  ;;  %801 = vmatpush.msra.mxu3 %v645_v27  ;;  %v602_v9 = vld [vmem:[#allocation8 + $0x88] sm:$0xff]  ;;  %v663_v27 = vld [vmem:[#allocation8 + $0x270] sm:$0xff] }
  0xc1   :  { %v304_v7 = vpop.f32.mrf.mxu2  ;;  %741 = vmatpush.msrb.mxu0 %v597_v23  ;;  %784 = vmatpush.msra.mxu2 %v626_v40  ;;  %v712_v23 = vld [vmem:[#allocation8 + $0x3f8] sm:$0xff]  ;;  %v709_v40 = vld [vmem:[#allocation8 + $0x3e0] sm:$0xff] }
  0xc2   :  { %v305_v11 = vadd.f32 %v1364_v36, %v304_v7  ;;  %759 = vmatpush.msrb.mxu1 %v615_v14  ;;  %802 = vmatpush.msra.mxu3 %v644_v31  ;;  %v635_v7 = vld [vmem:[#allocation8 + $0x190] sm:$0xff]  ;;  %v364_v14 = vpop.f32.mrf.mxu0  ;;  %v662_v31 = vld [vmem:[#allocation8 + $0x268] sm:$0xff] }
  0xc3   :  { %742 = vmatpush.msrb.mxu0 %v596_v28  ;;  %v679_v28 = vld [vmem:[#allocation8 + $0x2f0] sm:$0xff] }
  0xc4   :  { %v307_v17 = vmax.f32 %v305_v11, 0.0  ;;  %760 = vmatpush.msrb.mxu1 %v614_v19  ;;  %803 = vmatpush.msra.mxu3 %v643_v37  ;;  %v634_v11 = vld [vmem:[#allocation8 + $0x188] sm:$0xff]  ;;  %v664_v19 = vld [vmem:[#allocation8 + $0x278] sm:$0xff] }
  0xc5   :  { %743 = vmatpush.msrb.mxu0 %v595_v33  ;;  %v694_v33 = vld [vmem:[#allocation8 + $0x368] sm:$0xff] }
  0xc6   :  { %v554_v34 = vpop.permute.xlu0 %553  ;;  %308 = vst.msk [vmem:[#allocation2 + $0x6] sm:$0x3] %vm126_vm1, %v307_v17  ;;  %761 = vmatpush.msrb.mxu1 %v613_v24  ;;  %804 = vmatpush.msra.mxu3 %v642_v41  ;;  %v365_v17 = vadd.f32 %v1364_v36, %v364_v14  ;;  %v701_v14 = vld [vmem:[#allocation8 + $0x3a0] sm:$0xff] }
  0xc7   :  { %992 = vmatmul.msk.f32.vlgmr.msrb.gmra.mxu3 %vm101_vm0, %v554_v34  ;;  %v611_v34 = vld [vmem:[#allocation8 + $0xd0] sm:$0xff]  ;;  %744 = vmatpush.msrb.mxu0 %v594_v38  ;;  %v677_v38 = vld [vmem:[#allocation8 + $0x2e0] sm:$0xff] }
  0xc8   :  { %762 = vmatpush.msrb.mxu1 %v612_v29  ;;  %v367_v24 = vmax.f32 %v365_v17, 0.0  ;;  %v695_v29 = vld [vmem:[#allocation8 + $0x370] sm:$0xff] }
  0xc9   :  { %745 = vmatpush.msrb.mxu0 %v593_v42  ;;  %v424_v21 = vpop.f32.mrf.mxu2  ;;  %v660_v42 = vld [vmem:[#allocation8 + $0x258] sm:$0xff] }
  0xca   :  { %763 = vmatpush.msrb.mxu1 %v611_v34  ;;  %v425_v25 = vadd.f32 %v1364_v36, %v424_v21  ;;  %368 = vst.msk [vmem:[#allocation2 + $0x8] sm:$0x3] %vm126_vm1, %v367_v24  ;;  %v710_v34 = vld [vmem:[#allocation8 + $0x3e8] sm:$0xff]  ;;  %v484_v37 = vpop.f32.mrf.mxu0  ;;  %v700_v21 = vld [vmem:[#allocation8 + $0x398] sm:$0xff]  ;;  %v683_v24 = vld [vmem:[#allocation8 + $0x310] sm:$0xff] }
  0xcb   :  { %v485_v41 = vadd.f32 %v1364_v36, %v484_v37 }
  0xcc   :  { %764 = vmatpush.msrb.mxu1 %v610_v39  ;;  %v427_v26 = vmax.f32 %v425_v25, 0.0  ;;  %v693_v39 = vld [vmem:[#allocation8 + $0x360] sm:$0xff]  ;;  %v699_v25 = vld [vmem:[#allocation8 + $0x390] sm:$0xff] }
  0xce   :  { %765 = vmatpush.msrb.mxu1 %v609_v43  ;;  %428 = vst.msk [vmem:[#allocation2 + $0xa] sm:$0x3] %vm126_vm1, %v427_v26  ;;  %v676_v43 = vld [vmem:[#allocation8 + $0x2d8] sm:$0xff]  ;;  %v650_v26 = vld [vmem:[#allocation8 + $0x208] sm:$0xff] }
 0x11a   :  { %v214_v44 = vpop.f32.mrf.mxu3 }
 0x11b   :  { %v215_v45 = vadd.f32 %v1364_v36, %v214_v44  ;;  %v625_v44 = vld [vmem:[#allocation8 + $0x140] sm:$0xff] }
 0x11c   :  { %v153_v46 = vpop.f32.mrf.mxu1  ;;  %785 = vmatpush.msra.mxu2 %v625_v44  ;;  %v692_v44 = vld [vmem:[#allocation8 + $0x358] sm:$0xff] }
 0x11d   :  { %v154_v47 = vadd.f32 %v1364_v36, %v153_v46  ;;  %v217_v48 = vmax.f32 %v215_v45, 0.0  ;;  %v641_v45 = vld [vmem:[#allocation8 + $0x1c0] sm:$0xff] }
 0x11e   :  { %805 = vmatpush.msra.mxu3 %v641_v45  ;;  %v708_v45 = vld [vmem:[#allocation8 + $0x3d8] sm:$0xff] }
 0x11f   :  { %v156_v49 = vmax.f32 %v154_v47, 0.0  ;;  %219 = vrot.lane.b32.xlu0 %v217_v48, %s1143_s3  ;;  %v592_v47 = vld [vmem:[#allocation8 + $0x38] sm:$0xff] }
 0x120   :  { %v608_v48 = vld [vmem:[#allocation8 + $0xb8] sm:$0xff]  ;;  %746 = vmatpush.msrb.mxu0 %v592_v47  ;;  %v544_v47 = vpop.f32.mrf.mxu2 }
 0x121   :  { %158 = vrot.lane.b32.xlu2 %v156_v49, %s1143_s3  ;;  %v624_v49 = vld [vmem:[#allocation8 + $0x138] sm:$0xff]  ;;  %766 = vmatpush.msrb.mxu1 %v608_v48  ;;  %v545_v48 = vadd.f32 %v1364_v36, %v544_v47  ;;  %v930_v47 = vld [vmem:[#allocation9 + $0x68] sm:$0xff] }
 0x122   :  { %786 = vmatpush.msra.mxu2 %v624_v49  ;;  %v659_v49 = vld [vmem:[#allocation8 + $0x250] sm:$0xff] }
 0x12a   :  { %v334_v50 = vpop.f32.mrf.mxu3 }
 0x12b   :  { %v335_v51 = vadd.f32 %v1364_v36, %v334_v50  ;;  %v640_v50 = vld [vmem:[#allocation8 + $0x1b8] sm:$0xff] }
 0x12c   :  { %v274_v52 = vpop.f32.mrf.mxu1  ;;  %806 = vmatpush.msra.mxu3 %v640_v50  ;;  %v675_v50 = vld [vmem:[#allocation8 + $0x2d0] sm:$0xff] }
 0x12d   :  { %v275_v53 = vadd.f32 %v1364_v36, %v274_v52  ;;  %v337_v54 = vmax.f32 %v335_v51, 0.0  ;;  %v591_v51 = vld [vmem:[#allocation8 + $0x30] sm:$0xff] }
 0x12e   :  { %v607_v52 = vld [vmem:[#allocation8 + $0xb0] sm:$0xff]  ;;  %747 = vmatpush.msrb.mxu0 %v591_v51 }
 0x12f   :  { %v277_v55 = vmax.f32 %v275_v53, 0.0  ;;  %339 = vrot.lane.b32.xlu2 %v337_v54, %s1143_s3  ;;  %v623_v53 = vld [vmem:[#allocation8 + $0x130] sm:$0xff]  ;;  %767 = vmatpush.msrb.mxu1 %v607_v52 }
 0x130   :  { %v639_v54 = vld [vmem:[#allocation8 + $0x1b0] sm:$0xff]  ;;  %787 = vmatpush.msra.mxu2 %v623_v53  ;;  %v547_v53 = vmax.f32 %v545_v48, 0.0  ;;  %v929_v48 = vld [vmem:[#allocation9 + $0x60] sm:$0xff] }
 0x131   :  { %279 = vrot.lane.b32.xlu1 %v277_v55, %s1143_s3  ;;  %807 = vmatpush.msra.mxu3 %v639_v54  ;;  %v590_v55 = vld [vmem:[#allocation8 + $0x28] sm:$0xff]  ;;  %v691_v51 = vld [vmem:[#allocation8 + $0x350] sm:$0xff] }
 0x132   :  { %v454_v58 = vpop.f32.mrf.mxu3  ;;  %748 = vmatpush.msrb.mxu0 %v590_v55  ;;  %768 = vmatpush.msrb.mxu1 %v606_v56  ;;  %v707_v52 = vld [vmem:[#allocation8 + $0x3d0] sm:$0xff]  ;;  %v658_v54 = vld [vmem:[#allocation8 + $0x248] sm:$0xff]  ;;  %548 = vst.msk [vmem:[#allocation2 + $0xe] sm:$0x3] %vm126_vm1, %v547_v53 }
 0x133   :  { %v455_v60 = vadd.f32 %v1364_v36, %v454_v58  ;;  %v638_v58 = vld [vmem:[#allocation8 + $0x1a8] sm:$0xff]  ;;  %788 = vmatpush.msra.mxu2 %v622_v57 }
 0x134   :  { %v394_v61 = vpop.f32.mrf.mxu1  ;;  %808 = vmatpush.msra.mxu3 %v638_v58  ;;  %v674_v55 = vld [vmem:[#allocation8 + $0x2c8] sm:$0xff]  ;;  %v673_v58 = vld [vmem:[#allocation8 + $0x2c0] sm:$0xff] }
 0x135   :  { %v457_v62 = vmax.f32 %v455_v60, 0.0  ;;  %v395_v63 = vadd.f32 %v1364_v36, %v394_v61  ;;  %v589_v60 = vld [vmem:[#allocation8 + $0x20] sm:$0xff]  ;;  %v690_v56 = vld [vmem:[#allocation8 + $0x348] sm:$0xff] }
 0x136   :  { %v605_v61 = vld [vmem:[#allocation8 + $0xa0] sm:$0xff]  ;;  %749 = vmatpush.msrb.mxu0 %v589_v60  ;;  %v706_v57 = vld [vmem:[#allocation8 + $0x3c8] sm:$0xff] }
 0x137   :  { %v397_v0 = vmax.f32 %v395_v63, 0.0  ;;  %769 = vmatpush.msrb.mxu1 %v605_v61  ;;  %v637_v63 = vld [vmem:[#allocation8 + $0x1a0] sm:$0xff]  ;;  %v926_v53 = vld [vmem:[#allocation9 + $0x48] sm:$0xff] }
 0x138   :  { %809 = vmatpush.msra.mxu3 %v637_v63  ;;  %v705_v60 = vld [vmem:[#allocation8 + $0x3c0] sm:$0xff]  ;;  %v656_v63 = vld [vmem:[#allocation8 + $0x238] sm:$0xff] }
 0x139   :  { %459 = vrot.lane.b32.xlu1 %v457_v62, %s1143_s3  ;;  %399 = vrot.lane.b32.xlu0 %v397_v0, %s1143_s3  ;;  %v621_v62 = vld [vmem:[#allocation8 + $0x120] sm:$0xff]  ;;  %v588_v0 = vld [vmem:[#allocation8 + $0x18] sm:$0xff] }
 0x13a   :  { %789 = vmatpush.msra.mxu2 %v621_v62  ;;  %750 = vmatpush.msrb.mxu0 %v588_v0  ;;  %v672_v0 = vld [vmem:[#allocation8 + $0x2b8] sm:$0xff] }
 0x13c   :  { %v514_v1 = vpop.f32.mrf.mxu1 }
 0x13d   :  { %v515_v2 = vadd.f32 %v1364_v36, %v514_v1  ;;  %v604_v1 = vld [vmem:[#allocation8 + $0x98] sm:$0xff] }
 0x13e   :  { %770 = vmatpush.msrb.mxu1 %v604_v1  ;;  %v688_v1 = vld [vmem:[#allocation8 + $0x338] sm:$0xff] }
 0x13f   :  { %v517_v3 = vmax.f32 %v515_v2, 0.0  ;;  %v620_v2 = vld [vmem:[#allocation8 + $0x118] sm:$0xff] }
 0x140   :  { %790 = vmatpush.msra.mxu2 %v620_v2  ;;  %v704_v2 = vld [vmem:[#allocation8 + $0x3b8] sm:$0xff] }
 0x141   :  { %519 = vrot.lane.b32.xlu2 %v517_v3, %s1143_s3  ;;  %v636_v3 = vld [vmem:[#allocation8 + $0x198] sm:$0xff] }
 0x142   :  { %810 = vmatpush.msra.mxu3 %v636_v3  ;;  %v655_v3 = vld [vmem:[#allocation8 + $0x230] sm:$0xff] }
 0x144   :  { %811 = vmatpush.msra.mxu3 %v635_v7  ;;  %v654_v7 = vld [vmem:[#allocation8 + $0x228] sm:$0xff] }
 0x146   :  { %812 = vmatpush.msra.mxu3 %v634_v11  ;;  %v653_v11 = vld [vmem:[#allocation8 + $0x220] sm:$0xff] }
 0x148   :  { %813 = vmatpush.msra.mxu3 %v633_v16  ;;  %v668_v16 = vld [vmem:[#allocation8 + $0x298] sm:$0xff] }
 0x14a   :  { %v574_v4 = vpop.f32.mrf.mxu3  ;;  %878 = vmatpush.msrb.mxu3 %v712_v23  ;;  %v667_v23 = vld [vmem:[#allocation8 + $0x290] sm:$0xff] }
 0x14b   :  { %v575_v5 = vadd.f32 %v1364_v36, %v574_v4  ;;  %v587_v4 = vld [vmem:[#allocation8 + $0x10] sm:$0xff]  ;;  %v657_v36 = vld [vmem:[#allocation8 + $0x240] sm:$0xff] }
 0x14c   :  { %751 = vmatpush.msrb.mxu0 %v587_v4  ;;  %879 = vmatpush.msrb.mxu3 %v711_v30  ;;  %v671_v4 = vld [vmem:[#allocation8 + $0x2b0] sm:$0xff]  ;;  %v649_v30 = vld [vmem:[#allocation8 + $0x200] sm:$0xff] }
 0x14d   :  { %v577_v6 = vmax.f32 %v575_v5, 0.0  ;;  %v603_v5 = vld [vmem:[#allocation8 + $0x90] sm:$0xff] }
 0x14e   :  { %771 = vmatpush.msrb.mxu1 %v603_v5  ;;  %752 = vmatpush.msrb.mxu0 %v586_v8  ;;  %v687_v5 = vld [vmem:[#allocation8 + $0x330] sm:$0xff]  ;;  %v670_v8 = vld [vmem:[#allocation8 + $0x2a8] sm:$0xff] }
 0x14f   :  { %579 = vrot.lane.b32.xlu0 %v577_v6, %s1143_s3  ;;  %v619_v6 = vld [vmem:[#allocation8 + $0x110] sm:$0xff]  ;;  %880 = vmatpush.msrb.mxu3 %v710_v34 }
 0x150   :  { %791 = vmatpush.msra.mxu2 %v619_v6  ;;  %772 = vmatpush.msrb.mxu1 %v602_v9  ;;  %v703_v6 = vld [vmem:[#allocation8 + $0x3b0] sm:$0xff]  ;;  %v686_v9 = vld [vmem:[#allocation8 + $0x328] sm:$0xff] }
 0x151   :  { %753 = vmatpush.msrb.mxu0 %v585_v12  ;;  %881 = vmatpush.msrb.mxu3 %v709_v40  ;;  %v669_v12 = vld [vmem:[#allocation8 + $0x2a0] sm:$0xff] }
 0x152   :  { %792 = vmatpush.msra.mxu2 %v618_v10  ;;  %773 = vmatpush.msrb.mxu1 %v601_v13  ;;  %v702_v10 = vld [vmem:[#allocation8 + $0x3a8] sm:$0xff]  ;;  %v685_v13 = vld [vmem:[#allocation8 + $0x320] sm:$0xff] }
 0x153   :  { %818 = vmatpush.msra.mxu0 %v664_v19  ;;  %882 = vmatpush.msrb.mxu3 %v708_v45  ;;  %v932_v45 = vld [vmem:[#allocation9 + $0x78] sm:$0xff] }
 0x154   :  { %793 = vmatpush.msra.mxu2 %v617_v15  ;;  %838 = vmatpush.msra.mxu1 %v680_v20  ;;  %v652_v15 = vld [vmem:[#allocation8 + $0x218] sm:$0xff] }
 0x155   :  { %819 = vmatpush.msra.mxu0 %v663_v27  ;;  %883 = vmatpush.msrb.mxu3 %v707_v52  ;;  %v684_v20 = vld [vmem:[#allocation8 + $0x318] sm:$0xff]  ;;  %v666_v27 = vld [vmem:[#allocation8 + $0x288] sm:$0xff] }
 0x156   :  { %858 = vmatpush.msrb.mxu2 %v696_v22  ;;  %839 = vmatpush.msra.mxu1 %v679_v28  ;;  %v651_v22 = vld [vmem:[#allocation8 + $0x210] sm:$0xff]  ;;  %v682_v28 = vld [vmem:[#allocation8 + $0x308] sm:$0xff] }
 0x157   :  { %820 = vmatpush.msra.mxu0 %v662_v31  ;;  %884 = vmatpush.msrb.mxu3 %v706_v57  ;;  %v665_v31 = vld [vmem:[#allocation8 + $0x280] sm:$0xff]  ;;  %v923_v57 = vld [vmem:[#allocation9 + $0x30] sm:$0xff] }
 0x158   :  { %859 = vmatpush.msrb.mxu2 %v695_v29  ;;  %840 = vmatpush.msra.mxu1 %v678_v32  ;;  %v698_v29 = vld [vmem:[#allocation8 + $0x388] sm:$0xff]  ;;  %v681_v32 = vld [vmem:[#allocation8 + $0x300] sm:$0xff] }
 0x159   :  { %821 = vmatpush.msra.mxu0 %v661_v35  ;;  %885 = vmatpush.msrb.mxu3 %v705_v60  ;;  %v922_v60 = vld [vmem:[#allocation9 + $0x28] sm:$0xff] }
 0x15a   :  { %860 = vmatpush.msrb.mxu2 %v694_v33  ;;  %841 = vmatpush.msra.mxu1 %v677_v38  ;;  %v697_v33 = vld [vmem:[#allocation8 + $0x380] sm:$0xff] }
 0x15b   :  { %822 = vmatpush.msra.mxu0 %v660_v42  ;;  %886 = vmatpush.msrb.mxu3 %v704_v2 }
 0x15c   :  { %861 = vmatpush.msrb.mxu2 %v693_v39  ;;  %842 = vmatpush.msra.mxu1 %v676_v43 }
 0x15d   :  { %823 = vmatpush.msra.mxu0 %v659_v49  ;;  %887 = vmatpush.msrb.mxu3 %v703_v6  ;;  %v928_v49 = vld [vmem:[#allocation9 + $0x58] sm:$0xff]  ;;  %v917_v6 = vld [vmem:[#allocation9] sm:$0xff] }
 0x15e   :  { %862 = vmatpush.msrb.mxu2 %v692_v44  ;;  %843 = vmatpush.msra.mxu1 %v675_v50  ;;  %v1003_v50 = vld [vmem:[%s1423_s4] ss:$0 sm:$0xff] }
 0x15f   :  { %824 = vmatpush.msra.mxu0 %v658_v54  ;;  %888 = vmatpush.msrb.mxu3 %v702_v10 }
 0x160   :  { %863 = vmatpush.msrb.mxu2 %v691_v51  ;;  %844 = vmatpush.msra.mxu1 %v674_v55  ;;  %v927_v51 = vld [vmem:[#allocation9 + $0x50] sm:$0xff]  ;;  %v925_v55 = vld [vmem:[#allocation9 + $0x40] sm:$0xff] }
 0x161   :  { %825 = vmatpush.msra.mxu0 %v657_v36  ;;  %889 = vmatpush.msrb.mxu3 %v701_v14 }
 0x162   :  { %864 = vmatpush.msrb.mxu2 %v690_v56  ;;  %845 = vmatpush.msra.mxu1 %v673_v58  ;;  %v924_v56 = vld [vmem:[#allocation9 + $0x38] sm:$0xff] }
 0x163   :  { %826 = vmatpush.msra.mxu0 %v656_v63  ;;  %890 = vmatpush.msrb.mxu3 %v700_v21  ;;  %v920_v63 = vld [vmem:[#allocation9 + $0x18] sm:$0xff] }
 0x164   :  { %846 = vmatpush.msra.mxu1 %v672_v0 }
 0x165   :  { %827 = vmatpush.msra.mxu0 %v655_v3  ;;  %891 = vmatpush.msrb.mxu3 %v699_v25  ;;  %v919_v3 = vld [vmem:[#allocation9 + $0x10] sm:$0xff] }
 0x166   :  { %847 = vmatpush.msra.mxu1 %v671_v4 }
 0x167   :  { %828 = vmatpush.msra.mxu0 %v654_v7  ;;  %892 = vmatpush.msrb.mxu3 %v698_v29 }
 0x168   :  { %848 = vmatpush.msra.mxu1 %v670_v8 }
 0x169   :  { %829 = vmatpush.msra.mxu0 %v653_v11  ;;  %893 = vmatpush.msrb.mxu3 %v697_v33 }
 0x16a   :  { %849 = vmatpush.msra.mxu1 %v669_v12 }
 0x16b   :  { %830 = vmatpush.msra.mxu0 %v652_v15 }
 0x16c   :  { %850 = vmatpush.msra.mxu1 %v668_v16 }
 0x16d   :  { %831 = vmatpush.msra.mxu0 %v651_v22 }
 0x16e   :  { %851 = vmatpush.msra.mxu1 %v667_v23 }
 0x16f   :  { %832 = vmatpush.msra.mxu0 %v650_v26  ;;  %v1004_v26 = vld [vmem:[%s1425_s6] ss:$0 sm:$0xff] }
 0x170   :  { %852 = vmatpush.msra.mxu1 %v666_v27 }
 0x171   :  { %833 = vmatpush.msra.mxu0 %v649_v30 }
 0x172   :  { %853 = vmatpush.msra.mxu1 %v665_v31 }
 0x17b   :  { %v159_v46 = vpop.permute.xlu2 %158 }
 0x17c   :  { %162 = vst.msk [vmem:[#allocation2] sm:$0x3] %vm161_vm2, %v159_v46  ;;  %v487_v46 = vmax.f32 %v485_v41, 0.0 }
 0x17e   :  { %488 = vst.msk [vmem:[#allocation2 + $0xc] sm:$0x3] %vm126_vm1, %v487_v46  ;;  %v931_v46 = vld [vmem:[#allocation9 + $0x70] sm:$0xff] }
 0x189   :  { %v340_v59 = vpop.permute.xlu2 %339 }
 0x18a   :  { %342 = vst.msk [vmem:[#allocation2 + $0x6] sm:$0x3] %vm161_vm2, %v340_v59  ;;  %v689_v59 = vld [vmem:[#allocation8 + $0x340] sm:$0xff] }
 0x18b   :  { %865 = vmatpush.msrb.mxu2 %v689_v59 }
 0x18d   :  { %866 = vmatpush.msrb.mxu2 %v688_v1 }
 0x18f   :  { %867 = vmatpush.msrb.mxu2 %v687_v5  ;;  %v918_v5 = vld [vmem:[#allocation9 + $0x8] sm:$0xff] }
 0x191   :  { %v220_v18 = vpop.permute.xlu0 %219  ;;  %868 = vmatpush.msrb.mxu2 %v686_v9 }
 0x192   :  { %222 = vst.msk [vmem:[#allocation2 + $0x2] sm:$0x3] %vm161_vm2, %v220_v18 }
 0x193   :  { %869 = vmatpush.msrb.mxu2 %v685_v13 }
 0x195   :  { %870 = vmatpush.msrb.mxu2 %v684_v20 }
 0x197   :  { %871 = vmatpush.msrb.mxu2 %v683_v24 }
 0x199   :  { %872 = vmatpush.msrb.mxu2 %v682_v28 }
 0x19b   :  { %v520_v61 = vpop.permute.xlu2 %519  ;;  %873 = vmatpush.msrb.mxu2 %v681_v32 }
 0x19c   :  { %522 = vst.msk [vmem:[#allocation2 + $0xc] sm:$0x3] %vm161_vm2, %v520_v61 }
 0x1a3   :  { %v280_v62 = vpop.permute.xlu1 %279 }
 0x1a4   :  { %282 = vst.msk [vmem:[#allocation2 + $0x4] sm:$0x3] %vm161_vm2, %v280_v62  ;;  %v921_v62 = vld [vmem:[#allocation9 + $0x20] sm:$0xff] }
 0x1ab   :  { %v583_v17 = vld [vmem:[#allocation2] sm:$0xff]  ;;  %v460_v18 = vpop.permute.xlu1 %459  ;;  %v400_v19 = vpop.permute.xlu0 %399 }
 0x1ac   :  { %719 = vst [vmem:[#allocation1] ss:$4 sm:$0xff] %v583_v17 }
 0x1ad   :  { %462 = vst.msk [vmem:[#allocation2 + $0xa] sm:$0x3] %vm161_vm2, %v460_v18 }
 0x1ae   :  { %402 = vst.msk [vmem:[#allocation2 + $0x8] sm:$0x3] %vm161_vm2, %v400_v19 }
 0x1b3   :  { %v722_v34 = vld.sshfl [vmem:[#allocation1] sm:$0xff pattern:$0x73625140]  ;;  %v723_v35 = vld.sshfl [vmem:[#allocation1 + $0x8] sm:$0xff pattern:$0x73625140] }
 0x1b4   :  { %754 = vmatmul.f32.vlgmr.msrb.gmra.mxu0 %v722_v34  ;;  %774 = vmatmul.f32.vlgmr.msrb.gmra.mxu1 %v723_v35  ;;  %v724_v37 = vld.sshfl [vmem:[#allocation1 + $0x10] sm:$0xff pattern:$0x73625140]  ;;  %v725_v38 = vld.sshfl [vmem:[#allocation1 + $0x18] sm:$0xff pattern:$0x73625140] }
 0x1b5   :  { %794 = vmatmul.f32.vlgmr.msra.gmra.mxu2 %v724_v37  ;;  %814 = vmatmul.f32.vlgmr.msra.gmra.mxu3 %v725_v38 }
 0x1b6   :  { %937 = vmatpush.msrb.mxu0 %v932_v45 }
 0x1b8   :  { %938 = vmatpush.msrb.mxu0 %v931_v46 }
 0x1ba   :  { %939 = vmatpush.msrb.mxu0 %v930_v47 }
 0x1bc   :  { %940 = vmatpush.msrb.mxu0 %v929_v48 }
 0x1be   :  { %941 = vmatpush.msrb.mxu0 %v928_v49 }
 0x1c0   :  { %942 = vmatpush.msrb.mxu0 %v927_v51 }
 0x1c1   :  { %v580_v39 = vpop.permute.xlu0 %579 }
 0x1c2   :  { %582 = vst.msk [vmem:[#allocation2 + $0xe] sm:$0x3] %vm161_vm2, %v580_v39  ;;  %943 = vmatpush.msrb.mxu0 %v926_v53 }
 0x1c4   :  { %944 = vmatpush.msrb.mxu0 %v925_v55 }
 0x1c6   :  { %945 = vmatpush.msrb.mxu0 %v924_v56 }
 0x1c8   :  { %946 = vmatpush.msrb.mxu0 %v923_v57 }
 0x1c9   :  { %v584_v40 = vld [vmem:[#allocation2 + $0x8] sm:$0xff] }
 0x1ca   :  { %721 = vst [vmem:[#allocation1 + $0x20] ss:$4 sm:$0xff] %v584_v40  ;;  %947 = vmatpush.msrb.mxu0 %v922_v60 }
 0x1cc   :  { %948 = vmatpush.msrb.mxu0 %v921_v62 }
 0x1ce   :  { %949 = vmatpush.msrb.mxu0 %v920_v63 }
 0x1d0   :  { %950 = vmatpush.msrb.mxu0 %v919_v3 }
 0x1d1   :  { %v726_v41 = vld.sshfl [vmem:[#allocation1 + $0x20] sm:$0xff pattern:$0x73625140]  ;;  %v727_v42 = vld.sshfl [vmem:[#allocation1 + $0x28] sm:$0xff pattern:$0x73625140] }
 0x1d2   :  { %834 = vmatmul.f32.vlgmr.msra.gmra.mxu0 %v726_v41  ;;  %854 = vmatmul.f32.vlgmr.msra.gmra.mxu1 %v727_v42  ;;  %v728_v43 = vld.sshfl [vmem:[#allocation1 + $0x30] sm:$0xff pattern:$0x73625140]  ;;  %v729_v44 = vld.sshfl [vmem:[#allocation1 + $0x38] sm:$0xff pattern:$0x73625140] }
 0x1d3   :  { %874 = vmatmul.f32.vlgmr.msrb.gmra.mxu2 %v728_v43  ;;  %894 = vmatmul.f32.vlgmr.msrb.gmra.mxu3 %v729_v44 }
 0x1d4   :  { %951 = vmatpush.msrb.mxu0 %v918_v5 }
 0x1d6   :  { %952 = vmatpush.msrb.mxu0 %v917_v6 }
 0x231   :  { %v755_v52 = vpop.f32.mrf.mxu0  ;;  %v775_v36 = vpop.f32.mrf.mxu1 }
 0x232   :  { %v756_v54 = vadd.f32 %v1003_v50, %v755_v52 }
 0x234   :  { %v776_v59 = vadd.f32 %v775_v36, %v756_v54 }
 0x238   :  { %v795_v58 = vpop.f32.mrf.mxu2  ;;  %v815_v0 = vpop.f32.mrf.mxu3 }
 0x239   :  { %v796_v61 = vadd.f32 %v795_v58, %v776_v59 }
 0x23b   :  { %v816_v1 = vadd.f32 %v815_v0, %v796_v61 }
 0x24f   :  { %v835_v2 = vpop.f32.mrf.mxu0  ;;  %v855_v7 = vpop.f32.mrf.mxu1 }
 0x250   :  { %v836_v4 = vadd.f32 %v835_v2, %v816_v1 }
 0x252   :  { %v856_v8 = vadd.f32 %v855_v7, %v836_v4 }
 0x256   :  { %v875_v9 = vpop.f32.mrf.mxu2  ;;  %v895_v11 = vpop.f32.mrf.mxu3 }
 0x257   :  { %v876_v10 = vadd.f32 %v875_v9, %v856_v8 }
 0x259   :  { %v896_v12 = vadd.f32 %v895_v11, %v876_v10 }
 0x25b   :  { %v993_v13 = vmul.f32 -1.442695, %v896_v12 }
 0x25d   :  { %1005 = vpow2.f32 %v993_v13 }
 0x263   :  { %v1006_v14 = vpop.eup %1005 }
 0x264   :  { %v901_v15 = vadd.f32 1.0, %v1006_v14 }
 0x266   :  { %1007 = vrcp.f32 %v901_v15  ;;  %v913_v19 = vand.u32 2147483648, %v901_v15  ;;  %v911_v21 = vand.u32 2147483647, %v901_v15  ;;  %vm907_vm4 = vweird.f32 %v901_v15 }
 0x268   :  { %v914_v23 = vor.u32 1.1754944e-38, %v913_v19  ;;  %vm912_vm6 = vcmp.eq.f32.partialorder %v911_v21, 8.507059e+37 }
 0x26c   :  { %v1008_v16 = vpop.eup %1007 }
 0x26d   :  { %v903_v17 = vmul.f32 %v1008_v16, %v901_v15  ;;  %vm908_vm3 = vweird.f32 %v1008_v16 }
 0x26e   :  { %vm909_vm5 = vmor %vm907_vm4, %vm908_vm3 }
 0x26f   :  { %v904_v18 = vsub.f32 1.0, %v903_v17 }
 0x271   :  { %v905_v20 = vmul.f32 %v1008_v16, %v904_v18 }
 0x273   :  { %v906_v22 = vadd.f32 %v1008_v16, %v905_v20 }
 0x275   :  { %v910_v24 = vsel %vm909_vm5, %v1008_v16, %v906_v22 }
 0x276   :  { %v915_v25 = vsel %vm912_vm6, %v914_v23, %v910_v24 }
 0x277   :  { %953 = vmatmul.f32.vlgmr.msrb.gmra.mxu0 %v915_v25 }
 0x2f4   :  { %v954_v27 = vpop.f32.mrf.mxu0 }
 0x2f5   :  { %v955_v28 = vadd.f32 %v1004_v26, %v954_v27 }
 0x2f7   :  { %957 = vst [vmem:[#allocation11] sm:$0x3] %v955_v28 }
 0x2f8   :  { %968 = dma.vmem_to_hbm [thread:$0]  %s964_s25, 32, %s966_s28, [#allocation5]  }
 0x2f9   :  { %1135 = dma.done.wait [#allocation5], 32  }
 0x2fa   :  { %1136 = vsyncadd [#allocation5], 4294967264 }
 0x2fb   :  { %973 = vsyncpa [#allocation4], 1 }
 0x2fc   :  { %974 = vsyncpa [#allocation7], 1 }
 0x2fd   :  { %975 = vsyncpa [#allocation10], 1 }
 0x2fe   :  { %976 = vsyncpa [#allocation5], 1 }

</bundles_post_ra>
